<compile_context>
chip_gen: v7x
topology: tpu7x:2x2x1
jax: 0.10.0
libtpu: 0.0.40
codegen_flags: <defaults>
</compile_context>

<pallas_src>
import functools

import jax
import jax.numpy as jnp
from jax import lax
from jax.experimental import pallas as pl
from jax.experimental.pallas import tpu as pltpu


# ----------------------------- kernels --------------------------------------
def _cos_dist_kernel(V, H, qn_ref, e_ref, o_ref):
    """qn_ref: (B, V*H) pre-normalized query (native dtype).
       e_ref : (tile_m, V*H) raw example tile (native dtype).
       o_ref : (B, tile_m) f32 mean cosine distance."""
    acc = jnp.zeros(o_ref.shape, jnp.float32)
    for v in range(V):  # static unroll, V is small
        lo, hi = v * H, (v + 1) * H
        ev = e_ref[:, lo:hi]                       # (tile_m, H) native dtype
        ef = ev.astype(jnp.float32)
        # F.normalize(p=2, dim=-1) clamp: x / max(||x||, 1e-12)  ==  x * rsqrt(max(||x||^2, 1e-24))
        inv = lax.rsqrt(jnp.maximum(jnp.sum(ef * ef, axis=-1, keepdims=True), 1e-24))
        en = (ef * inv).astype(e_ref.dtype)        # normalize in f32, cast back for the MXU
        qv = qn_ref[:, lo:hi]                      # (B, H), already normalized
        # (B, H) x (tile_m, H)^T -> (B, tile_m), f32 accumulation on the MXU
        acc = acc + lax.dot_general(
            qv, en, (((1,), (1,)), ((), ())), preferred_element_type=jnp.float32)
    o_ref[...] = (1.0 - acc * (1.0 / V)).astype(o_ref.dtype)


def _l2_dist_kernel(V, q_ref, qsq_ref, e_ref, o_ref):
    """mean_v ||q_v - e_v||^2 = (||q_flat||^2 + ||e_flat||^2 - 2 <q_flat, e_flat>) / V
       q_ref  : (B, V*H) flattened query (native dtype).
       qsq_ref: (B, 1) f32 precomputed ||q_flat||^2 (hoisted).
       e_ref  : (tile_m, V*H) example tile (native dtype).
       o_ref  : (B, tile_m) f32."""
    e = e_ref[...]
    ef = e.astype(jnp.float32)
    esq = jnp.sum(ef * ef, axis=-1)                # (tile_m,)
    qe = lax.dot_general(q_ref[...], e, (((1,), (1,)), ((), ())),
                         preferred_element_type=jnp.float32)   # (B, tile_m)
    d = (qsq_ref[...] + esq[None, :] - 2.0 * qe) * (1.0 / V)
    o_ref[...] = d.astype(o_ref.dtype)


# ----------------------------- wrapper ---------------------------------------
def compute_distance(query_emb, example_emb, *, distance="cos", tile_m=512):
    """Pallas implementation of EmbeddingRetriever.compute_distance
    (reduction='mean', combination=None).

    query_emb  : (B, V, H)
    example_emb: (M, V, H)
    returns    : (B, M) float32
    """
    B, V, H = query_emb.shape
    M, V2, H2 = example_emb.shape
    assert V == V2 and H == H2
    K = V * H
    cdt = example_emb.dtype  # streaming / MXU operand dtype (pass bf16 to halve HBM traffic)
    itemsize = jnp.dtype(cdt).itemsize

    # Lane-dense 2-D layout for the big operand (free reshape: contiguous).
    e_flat = example_emb.reshape(M, K)

    # Tile size: multiple of 128 lanes for an unmasked, lane-dense output store.
    tile_m = max(128, (int(tile_m) // 128) * 128)
    m_pad = -(-M // tile_m) * tile_m
    if m_pad != M:
        # Zero-padded rows produce finite garbage that is sliced off below.
        e_flat = jnp.pad(e_flat, ((0, m_pad - M), (0, 0)))

    qf = query_emb.astype(jnp.float32).reshape(B, K)

    if distance == "cos":
        # Hoist query normalization: the q block is resident across the whole grid.
        qf3 = query_emb.astype(jnp.float32)
        inv = lax.rsqrt(jnp.maximum(jnp.sum(qf3 * qf3, axis=-1, keepdims=True), 1e-24))
        q_in = (qf3 * inv).reshape(B, K).astype(cdt)
        kernel = functools.partial(_cos_dist_kernel, V, H)
        operands = (q_in, e_flat)
        in_specs = [
            pl.BlockSpec((B, K), lambda j: (0, 0)),        # resident query
            pl.BlockSpec((tile_m, K), lambda j: (j, 0)),   # streamed database tile
        ]
        transcendentals = m_pad * V + B * V
    elif distance == "l2":
        q_in = qf.astype(cdt)
        qsq = jnp.sum(qf * qf, axis=-1, keepdims=True)     # (B, 1) f32, hoisted
        kernel = functools.partial(_l2_dist_kernel, V)
        operands = (q_in, qsq, e_flat)
        in_specs = [
            pl.BlockSpec((B, K), lambda j: (0, 0)),
            pl.BlockSpec((B, 1), lambda j: (0, 0)),
            pl.BlockSpec((tile_m, K), lambda j: (j, 0)),
        ]
        transcendentals = 0
    else:
        raise ValueError(f"Unknown distance metric: {distance}")

    cost = pl.CostEstimate(
        flops=2 * B * m_pad * K,
        bytes_accessed=B * K * itemsize + m_pad * K * itemsize + B * m_pad * 4,
        transcendentals=transcendentals,
    )

    out = pl.pallas_call(
        kernel,
        out_shape=jax.ShapeDtypeStruct((B, m_pad), jnp.float32),
        grid=(m_pad // tile_m,),
        in_specs=in_specs,
        out_specs=pl.BlockSpec((B, tile_m), lambda j: (0, j)),
        compiler_params=pltpu.CompilerParams(dimension_semantics=("parallel",)),
        cost_estimate=cost,
    )(*operands)
    return out[:, :M]


# ---------------- pure-JAX reference (mirrors my_cos_sim / my_l2_dist) -------
def _ref_compute_distance(q, e, distance="cos"):
    q = q.astype(jnp.float32)
    e = e.astype(jnp.float32)
    if distance == "cos":
        qn = q / jnp.maximum(jnp.linalg.norm(q, axis=-1, keepdims=True), 1e-12)
        en = e / jnp.maximum(jnp.linalg.norm(e, axis=-1, keepdims=True), 1e-12)
        cos = jnp.einsum("bvh,mvh->bmv", qn, en)
        d = 1.0 - cos
    else:
        d = jnp.sum((q[:, None, :, :] - e[None, :, :, :]) ** 2, axis=-1)
    return jnp.mean(d, axis=-1)


if __name__ == "__main__":
    # Small, TPU-friendly synthetic shapes:
    #   batch B=8, memory M=1024, num span vectors V=2, hidden H=128
    B, M, V, H = 8, 1024, 2, 128
    key = jax.random.PRNGKey(0)
    kq, ke = jax.random.split(key)
    query_emb = jax.random.normal(kq, (B, V, H), dtype=jnp.float32)
    example_emb = jax.random.normal(ke, (M, V, H), dtype=jnp.float32)

    ok = True

    # f32 path: tight tolerance against the reference.
    for dist in ("cos", "l2"):
        out = compute_distance(query_emb, example_emb, distance=dist)
        out = jax.block_until_ready(out)
        ref = _ref_compute_distance(query_emb, example_emb, distance=dist)
        if not jnp.allclose(out, ref, atol=1e-4, rtol=1e-4):
            ok = False
            print(f"MISMATCH (f32) distance={dist}: "
                  f"max abs err = {float(jnp.max(jnp.abs(out - ref)))}")

    # bf16 streaming path (halves HBM traffic; f32 normalization/accumulation
    # inside the kernel): looser tolerance.
    q_bf16 = query_emb.astype(jnp.bfloat16)
    e_bf16 = example_emb.astype(jnp.bfloat16)
    for dist in ("cos", "l2"):
        out = compute_distance(q_bf16, e_bf16, distance=dist)
        out = jax.block_until_ready(out)
        ref = _ref_compute_distance(q_bf16, e_bf16, distance=dist)
        if not jnp.allclose(out, ref, atol=2e-2, rtol=2e-2):
            ok = False
            print(f"MISMATCH (bf16) distance={dist}: "
                  f"max abs err = {float(jnp.max(jnp.abs(out - ref)))}")

    if ok:
        print("KERNEL_OK")
</pallas_src>

<mosaic_0001>
module attributes {stable_mosaic.version = 11 : i64} {
  func.func @_cos_dist_kernel(%arg0: i32, %arg1: memref<8x256xf32, #tpu.memory_space<vmem>>, %arg2: memref<512x256xf32, #tpu.memory_space<vmem>>, %arg3: memref<8x512xf32, #tpu.memory_space<vmem>>) attributes {dimension_semantics = [#tpu.dimension_semantics<parallel>], iteration_bounds = array<i64: 2>, scalar_prefetch = 0 : i64, scratch_operands = 0 : i64, tpu.core_type = #tpu.core_type<tc>, window_params = [{pipeline_mode = #tpu.pipeline_mode<synchronous>, transform_indices = @transform_0, window_bounds = array<i64: 8, 256>}, {transform_indices = @transform_1, window_bounds = array<i64: 512, 256>}, {transform_indices = @transform_2, window_bounds = array<i64: 8, 512>}]} {
    %cst = arith.constant 0.000000e+00 : f32
    %0 = vector.broadcast %cst : f32 to vector<8x512xf32>
    %c0 = arith.constant 0 : index
    %c0_0 = arith.constant 0 : index
    %1 = vector.load %arg2[%c0, %c0_0] : memref<512x256xf32, #tpu.memory_space<vmem>>, vector<512x128xf32>
    %2 = arith.mulf %1, %1 : vector<512x128xf32>
    %cst_1 = arith.constant dense<0.000000e+00> : vector<512xf32>
    %3 = vector.multi_reduction <add>, %2, %cst_1 [1] : vector<512x128xf32> to vector<512xf32>
    %4 = vector.shape_cast %3 : vector<512xf32> to vector<512x1xf32>
    %cst_2 = arith.constant 1.000000e-24 : f32
    %5 = vector.broadcast %cst_2 : f32 to vector<512x1xf32>
    %6 = arith.maximumf %4, %5 : vector<512x1xf32>
    %7 = math.rsqrt %6 : vector<512x1xf32>
    %8 = vector.broadcast %7 : vector<512x1xf32> to vector<512x128xf32>
    %9 = arith.mulf %1, %8 : vector<512x128xf32>
    %c0_3 = arith.constant 0 : index
    %c0_4 = arith.constant 0 : index
    %10 = vector.load %arg1[%c0_3, %c0_4] : memref<8x256xf32, #tpu.memory_space<vmem>>, vector<8x128xf32>
    %cst_5 = arith.constant dense<0.000000e+00> : vector<8x512xf32>
    %11 = tpu.matmul %10, %9, %cst_5 {dimension_numbers = #tpu.dot_dimension_numbers<[1], [1], [0], [0], [0, 0, 1, 0], [], []>} : vector<8x128xf32>, vector<512x128xf32>, vector<8x512xf32> -> vector<8x512xf32>
    %12 = arith.addf %0, %11 : vector<8x512xf32>
    %c0_6 = arith.constant 0 : index
    %c128 = arith.constant 128 : index
    %13 = vector.load %arg2[%c0_6, %c128] : memref<512x256xf32, #tpu.memory_space<vmem>>, vector<512x128xf32>
    %14 = arith.mulf %13, %13 : vector<512x128xf32>
    %cst_7 = arith.constant dense<0.000000e+00> : vector<512xf32>
    %15 = vector.multi_reduction <add>, %14, %cst_7 [1] : vector<512x128xf32> to vector<512xf32>
    %16 = vector.shape_cast %15 : vector<512xf32> to vector<512x1xf32>
    %cst_8 = arith.constant 1.000000e-24 : f32
    %17 = vector.broadcast %cst_8 : f32 to vector<512x1xf32>
    %18 = arith.maximumf %16, %17 : vector<512x1xf32>
    %19 = math.rsqrt %18 : vector<512x1xf32>
    %20 = vector.broadcast %19 : vector<512x1xf32> to vector<512x128xf32>
    %21 = arith.mulf %13, %20 : vector<512x128xf32>
    %c0_9 = arith.constant 0 : index
    %c128_10 = arith.constant 128 : index
    %22 = vector.load %arg1[%c0_9, %c128_10] : memref<8x256xf32, #tpu.memory_space<vmem>>, vector<8x128xf32>
    %cst_11 = arith.constant dense<0.000000e+00> : vector<8x512xf32>
    %23 = tpu.matmul %22, %21, %cst_11 {dimension_numbers = #tpu.dot_dimension_numbers<[1], [1], [0], [0], [0, 0, 1, 0], [], []>} : vector<8x128xf32>, vector<512x128xf32>, vector<8x512xf32> -> vector<8x512xf32>
    %24 = arith.addf %12, %23 : vector<8x512xf32>
    %cst_12 = arith.constant 5.000000e-01 : f32
    %25 = vector.broadcast %cst_12 : f32 to vector<8x512xf32>
    %26 = arith.mulf %24, %25 : vector<8x512xf32>
    %cst_13 = arith.constant 1.000000e+00 : f32
    %27 = vector.broadcast %cst_13 : f32 to vector<8x512xf32>
    %28 = arith.subf %27, %26 : vector<8x512xf32>
    %c0_14 = arith.constant 0 : index
    %c0_15 = arith.constant 0 : index
    %29 = vector.load %arg3[%c0_14, %c0_15] : memref<8x512xf32, #tpu.memory_space<vmem>>, vector<8x512xf32>
    tpu.vector_store %arg3[%c0_14, %c0_15], %28 {strides = array<i32>} : memref<8x512xf32, #tpu.memory_space<vmem>>, vector<8x512xf32>,
    return
  }
  func.func @transform_0(%arg0: i32) -> (i32, i32) {
    %c0_i32 = arith.constant 0 : i32
    %c0_i32_0 = arith.constant 0 : i32
    %c0_i32_1 = arith.constant 0 : i32
    return %c0_i32, %c0_i32_0 : i32, i32
  }
  func.func @transform_1(%arg0: i32) -> (i32, i32) {
    %c0_i32 = arith.constant 0 : i32
    %c0_i32_0 = arith.constant 0 : i32
    return %arg0, %c0_i32 : i32, i32
  }
  func.func @transform_2(%arg0: i32) -> (i32, i32) {
    %c0_i32 = arith.constant 0 : i32
    %c0_i32_0 = arith.constant 0 : i32
    return %c0_i32, %arg0 : i32, i32
  }
}

</mosaic_0001>

<bundles_post_ra>
// kernel: tpu_custom_call.1
= control target key start
LH: loop header
LB: loop body
LE: loop exit
PB: predicated region body
PF: predicated region fallthrough
CT: control target
= control target key end

     0   :  { %7 = vsyncpa [#allocation3], 0  ;;  %s2961_s0 = inlined_call_operand.hbm [shape: f32[8,256], index: 0, kind: input, shape index: {}]   ;;  %s2962_s1 = inlined_call_operand.hbm [shape: f32[1024,256], index: 1, kind: input, shape index: {}]   ;;  %s2963_s2 = inlined_call_operand.hbm [shape: f32[8,1024], index: 2, kind: output, shape index: {}]  }
   0x1   :  { %8 = vsyncpa [#allocation6], 0 }
   0x2   :  { %10 = vsyncpa [#allocation6 + $0x1], 0 }
   0x3   :  { %11 = vsyncpa [#allocation4], 0 }
   0x4   :  { %13 = vsyncpa [#allocation4 + $0x1], 0  ;;  %s2302_s9 = smov 0   ;;  %s2304_s10 = smov 0  }
   0x5   :  { %s2306_s11 = smov 0   ;;  %s2308_s12 = smov 0  }
   0x6 LB: > { %s2323_s13 = sadd.s32 4294967295, %s2280_s12   ;;  %s1469_s14 = sadd.s32 4294967294, %s2280_s12   ;;  %s2280_s12 = sphi %s2308_s12, %s2988_s12   ;;  %s2276_s11 = sphi %s2306_s11, %s2987_s11   ;;  %s2272_s10 = sphi %s2304_s10, %s2986_s10   ;;  %s2268_s9 = sphi %s2302_s9, %s2985_s9  }
   0x7   : > { %s2327_s15 = sadd.s32 1, %s2280_s12   ;;  %s47_s16 = sadd.s32 1, %s2276_s11 }
   0x8   : > { %s44_s17 = ssub.s32 %s2280_s12, %s2327_s15  ;;  %p54_p0 = scmp.ne.s32.totalorder %s2276_s11, %s2272_s10 }
   0x9   : > { %p45_p1 = scmp.eq.s32.totalorder %s44_s17, 0  ;;  %p55_p2 = scmp.eq.s32.totalorder %s2280_s12, 0 }
   0xa   : > { %p60_p3 = scmp.ne.s32.totalorder %s2272_s10, %s2268_s9  ;;  %p2964_p4 = scmp.eq.s32.totalorder %s2323_s13, 0 }
   0xb   : > { %s2339_s18 = scalar_select %p45_p1, %s2276_s11, %s47_s16  }
   0xc   : > { %p2341_p5 = por %p55_p2, %p54_p0  ;;  %p2347_p6 = por %p2964_p4, %p60_p3 }
   0xd   : > { %p84_p7 = scmp.eq.s32.totalorder %s2323_s13, 1  ;;  %p90_p8 = scmp.eq.s32.totalorder %s1469_s14, 1 }
   0xe   : > { %s2970_s20 = scalar_select %p2347_p6, 1, 0 }
   0xf   : > { %p1470_p9 = scmp.ge.s32.totalorder %s2280_s12, 1  ;;  %p97_p10 = scmp.lt.s32.totalorder %s2280_s12, 3 }
  0x10   : > { %p2354_p11 = por %p84_p7, %p54_p0  ;;  %p2358_p12 = por %p90_p8, %p60_p3 }
  0x11   : > { %p2362_p13 = pnand %p1470_p9, %p97_p10  ;;  %s2282_s24 = smov [#allocation2]  }
  0x12   : > { %s2971_s21 = scalar_select %p2354_p11, 1, 0 }
  0x13   : > { %s2972_s22 = scalar_select %p2358_p12, 1, 0 }
  0x14   : > { %s2973_s23 = scalar_select %p2362_p13, 1, 0 }
  0x15   : > { %p1765_p2 = pneg %p2362_p13  ;;  %s110_s25 = sshll.u32 %s2282_s24, 4  ;;  %s111_s25 = int_to_ptr.vmem [resolvable:$true] %s110_s25 }
  0x16   : > { %p1778_p4 = scmp.lt.s32.totalorder %s2280_s12, 2  ;;  %p2974_p0 = scmp.eq.s32.totalorder %s2323_s13, 0 }
  0x17   : > { %s121_s27 = sand.u32 1, %s2276_s11   ;;  %s2152_s4 = scalar_lea.hbm %s2961_s0, 256 }
  0x18   : > { %p2372_p7 = pnand %p1765_p2, %p2974_p0  ;;  %p2379_p3 = pnand %p1778_p4, %p2341_p5 }
  0x19   : > { %s1473_s29 = sshll.u32 %s121_s27, 10  ;;  %p2153_p8 = scmp.ne.s32.totalorder %s2961_s0, %s2152_s4 }
  0x1a   : > { %s2976_s28 = scalar_select %p2379_p3, 1, 0 }
  0x1b   : > { %p2154_p9 = pneg %p2372_p7  ;;  %p2159_p4 = scmp.lt.u32.totalorder %s2152_s4, %s2961_s0 }
  0x1d   : > { %p2155_p10 = pnand %p2154_p9, %p2153_p8 }
  0x1f   : > { %p2156_p2 = pneg %p2155_p10 }
  0x21   : > { %p2161_p5 = pnand %p2159_p4, %p2156_p2 }
  0x23   : > { %2164 = shalt.err (!%p2161_p5)
}
  0x24   : > { %s2165_s14 = scalar_lea.vmem %s111_s25, 256  ;;  %p2173_p11 = scmp.lt.s32.totalorder %s111_s25, %s111_s25 }
  0x25   : > { %p2166_p0 = scmp.ne.s32.totalorder %s111_s25, %s2165_s14  ;;  %p2174_p6 = scmp.lt.s32.totalorder %s2165_s14, %s2165_s14 }
  0x27   : > { %p2168_p1 = pnand %p2166_p0, %p2154_p9  ;;  %p2175_p13 = por %p2174_p6, %p2173_p11 }
  0x29   : > { %p2169_p12 = pneg %p2168_p1 }
  0x2b   : > { %p2176_p3 = pnand %p2175_p13, %p2169_p12 }
  0x2d   : > { %2179 = shalt.err (!%p2176_p3)
}
  0x2e   : > { %1768 = dma.hbm_to_vmem [thread:$0]  (!%p2372_p7), %s2961_s0, 256, %s111_s25, [#allocation3]  }
  0x2f   : > { %s1487_s19 = sshll.u32 %s2280_s12, 14  ;;  %s125_s24 = scalar_lea.vmem [#allocation5], %s1473_s29 }
  0x30   : > { %s133_s30 = sshll.u32 %s125_s24, 4  ;;  %s2403_s5 = scalar_lea.hbm %s2962_s1, %s1487_s19  ;;  %s2405_s30 = int_to_ptr.vmem [resolvable:$true] %s133_s30 }
  0x31   : > { %s2407_s26 = scalar_lea.sflag [#allocation6], %s121_s27  ;;  %s2180_s6 = scalar_lea.hbm %s2403_s5, 16384 }
  0x32   : > { %p2181_p6 = scmp.ne.s32.totalorder %s2403_s5, %s2180_s6  ;;  %p2977_p11 = scmp.ne.s32.totalorder %s2976_s28, 0 }
  0x33   : > { %s2185_s7 = scalar_lea.hbm %s2962_s1, 32768  ;;  %p2186_p7 = scmp.lt.u32.totalorder %s2403_s5, %s2962_s1 }
  0x34   : > { %p2182_p12 = pneg %p2977_p11  ;;  %p2187_p3 = scmp.lt.u32.totalorder %s2185_s7, %s2180_s6 }
  0x35   : > { %p2189_p9 = scmp.lt.u32.totalorder %s2180_s6, %s2403_s5 }
  0x36   : > { %p2183_p13 = pnand %p2182_p12, %p2181_p6  ;;  %p2188_p8 = por %p2187_p3, %p2186_p7 }
  0x38   : > { %p2184_p1 = pneg %p2183_p13  ;;  %p2190_p10 = por %p2189_p9, %p2188_p8 }
  0x3a   : > { %p2191_p2 = pnand %p2190_p10, %p2184_p1 }
  0x3c   : > { %2194 = shalt.err (!%p2191_p2)
}
  0x3d   : > { %s2195_s27 = scalar_lea.vmem %s2405_s30, 16384  ;;  %s2283_s16 = smov [#allocation5]  }
  0x3e   : > { %p2196_p4 = scmp.ne.s32.totalorder %s2405_s30, %s2195_s27  ;;  %s2200_s17 = sshll.u32 %s2283_s16, 4  ;;  %s2201_s17 = int_to_ptr.vmem [resolvable:$false] %s2200_s17 }
  0x3f   : > { %s2202_s19 = scalar_lea.vmem %s2201_s17, 32768  ;;  %p2203_p6 = scmp.lt.s32.totalorder %s2405_s30, %s2201_s17 }
  0x40   : > { %p2198_p5 = pnand %p2196_p4, %p2182_p12  ;;  %p2204_p13 = scmp.lt.s32.totalorder %s2202_s19, %s2195_s27 }
  0x42   : > { %p2199_p0 = pneg %p2198_p5  ;;  %p2205_p7 = por %p2204_p13, %p2203_p6 }
  0x44   : > { %p2206_p3 = pnand %p2205_p7, %p2199_p0 }
  0x46   : > { %2209 = shalt.err (!%p2206_p3)
}
  0x47   : > { %s2284_s24 = smov 256   ;;  %s2285_s3 = smov 16  }
  0x48   : > { %1772 = dma.hbm_to_vmem [thread:$0]  (!%p2977_p11), %s2403_s5, 16384, %s2405_s30, %s2407_s26, %s2284_s24, %s2284_s24, %s2285_s3  }
  0x49   : > { %p2978_p12 = scmp.ne.s32.totalorder %s2973_s23, 0 }
  0x4a   : > { %p2979_p1 = scmp.eq.s32.totalorder (!%p2978_p12), %s2323_s13, 0 }
  0x4b   : > { %145 = sbr.rel (%p2978_p12) target bundleno = 740 (0x2e4), region = 28 }
  0x52   : > { %2255 = dma.done.wait (%p2979_p1), [#allocation3], 256   ;;  %p2980_p8 = pmov %p2979_p1 }
  0x53   : > { %s2442_s4 = sand.u32 1, %s2272_s10   ;;  %p2981_p11 = scmp.ne.s32.totalorder %s2970_s20, 0 }
  0x54   : > { %2257 = vsyncadd (%p2980_p8), [#allocation3], 4294967040  ;;  %s1479_s6 = sshll.u32 %s2442_s4, 10  ;;  %s152_s25 = scalar_lea.sflag [#allocation6], %s2442_s4 }
  0x55   : > { %s2446_s29 = scalar_lea.vmem [#allocation5], %s1479_s6 }
  0x56   : > { %2259 = dma.done.wait (%p2981_p11), %s152_s25, 16384  }
  0x57   : > { %2261 = vsyncadd (%p2981_p11), %s152_s25, 4294950912  ;;  %v2453_v0 = vld [vmem:[%s2446_s29 + $0x308] sm:$0xff]  ;;  %v2459_v2 = vld [vmem:[%s2446_s29 + $0x318] sm:$0xff]  ;;  %s1480_s20 = sshll.u32 %s2442_s4, 5  ;;  %s1488_s28 = sshll.u32 %s2323_s13, 9 }
  0x58   : > { %v2456_v1 = vld [vmem:[%s2446_s29 + $0x108] sm:$0xff]  ;;  %v739_v3 = vmul.f32 %v2453_v0, %v2453_v0  ;;  %v2466_v5 = vld [vmem:[%s2446_s29 + $0x118] sm:$0xff]  ;;  %v740_v6 = vmul.f32 %v2459_v2, %v2459_v2  ;;  %s175_s23 = scalar_lea.vmem [#allocation7], %s1480_s20  ;;  %s2917_s7 = scalar_lea.hbm %s2963_s2, %s1488_s28 }
  0x59   : > { %v707_v4 = vmul.f32 %v2456_v1, %v2456_v1  ;;  %v708_v7 = vmul.f32 %v2466_v5, %v2466_v5  ;;  %v2473_v8 = vld [vmem:[%s2446_s29 + $0x18] sm:$0xff]  ;;  %v2476_v9 = vld [vmem:[%s2446_s29 + $0x8] sm:$0xff]  ;;  %s1387_s30 = sshll.u32 %s175_s23, 4  ;;  %s1373_s8 = scalar_lea.sflag [#allocation4], %s2442_s4  ;;  %s2919_s30 = int_to_ptr.vmem [resolvable:$true] %s1387_s30 }
  0x5a   : > { %851 = vadd.xlane.f32.xlu1 %v739_v3  ;;  %v692_v10 = vmul.f32 %v2473_v8, %v2473_v8  ;;  %v691_v11 = vmul.f32 %v2476_v9, %v2476_v9  ;;  %v2483_v12 = vld [vmem:[%s2446_s29 + $0x218] sm:$0xff]  ;;  %v2486_v13 = vld [vmem:[%s2446_s29 + $0x208] sm:$0xff]  ;;  %s2210_s14 = scalar_lea.vmem %s2919_s30, 512  ;;  %p2982_p10 = scmp.ne.s32.totalorder %s2971_s21, 0 }
  0x5b   : > { %787 = vadd.xlane.f32.xlu0 %v707_v4  ;;  %v724_v14 = vmul.f32 %v2483_v12, %v2483_v12  ;;  %v723_v15 = vmul.f32 %v2486_v13, %v2486_v13  ;;  %v2493_v16 = vld [vmem:[%s2446_s29 + $0x138] sm:$0xff]  ;;  %v2496_v17 = vld [vmem:[%s2446_s29 + $0x128] sm:$0xff]  ;;  %p2211_p9 = scmp.ne.s32.totalorder %s2919_s30, %s2210_s14  ;;  %s2286_s13 = smov [#allocation7]  }
  0x5c   : > { %v710_v18 = vmul.f32 %v2493_v16, %v2493_v16  ;;  %v709_v19 = vmul.f32 %v2496_v17, %v2496_v17  ;;  %v2503_v20 = vld [vmem:[%s2446_s29 + $0x338] sm:$0xff]  ;;  %v2506_v21 = vld [vmem:[%s2446_s29 + $0x328] sm:$0xff]  ;;  %s2214_s27 = sshll.u32 %s2286_s13, 4  ;;  %s2215_s27 = int_to_ptr.vmem [resolvable:$false] %s2214_s27 }
  0x5d   : > { %v742_v22 = vmul.f32 %v2503_v20, %v2503_v20  ;;  %v741_v23 = vmul.f32 %v2506_v21, %v2506_v21  ;;  %v2513_v24 = vld [vmem:[%s2446_s29 + $0x38] sm:$0xff]  ;;  %v2516_v25 = vld [vmem:[%s2446_s29 + $0x28] sm:$0xff]  ;;  %p2212_p2 = pnand %p2211_p9, %p2982_p10  ;;  %s2216_s16 = scalar_lea.vmem %s2215_s27, 1024 }
  0x5e   : > { %853 = vadd.xlane.f32.xlu1 %v740_v6  ;;  %v694_v26 = vmul.f32 %v2513_v24, %v2513_v24  ;;  %v693_v27 = vmul.f32 %v2516_v25, %v2516_v25  ;;  %v2523_v28 = vld [vmem:[%s2446_s29 + $0x238] sm:$0xff]  ;;  %v2526_v29 = vld [vmem:[%s2446_s29 + $0x228] sm:$0xff]  ;;  %p2217_p5 = scmp.lt.s32.totalorder %s2919_s30, %s2215_s27  ;;  %p2218_p0 = scmp.lt.s32.totalorder %s2216_s16, %s2210_s14 }
  0x5f   : > { %789 = vadd.xlane.f32.xlu0 %v708_v7  ;;  %v726_v30 = vmul.f32 %v2523_v28, %v2523_v28  ;;  %v725_v31 = vmul.f32 %v2526_v29, %v2526_v29  ;;  %v2533_v32 = vld [vmem:[%s2446_s29 + $0x158] sm:$0xff]  ;;  %v2536_v33 = vld [vmem:[%s2446_s29 + $0x148] sm:$0xff]  ;;  %p2213_p4 = pneg %p2212_p2 }
  0x60   : > { %v712_v34 = vmul.f32 %v2533_v32, %v2533_v32  ;;  %v711_v35 = vmul.f32 %v2536_v33, %v2536_v33  ;;  %v2543_v36 = vld [vmem:[%s2446_s29 + $0x358] sm:$0xff]  ;;  %v2546_v37 = vld [vmem:[%s2446_s29 + $0x348] sm:$0xff]  ;;  %p2219_p6 = por %p2218_p0, %p2217_p5 }
  0x61   : > { %v744_v38 = vmul.f32 %v2543_v36, %v2543_v36  ;;  %v743_v39 = vmul.f32 %v2546_v37, %v2546_v37  ;;  %v2553_v40 = vld [vmem:[%s2446_s29 + $0x58] sm:$0xff]  ;;  %v2556_v41 = vld [vmem:[%s2446_s29 + $0x48] sm:$0xff] }
  0x62   : > { %757 = vadd.xlane.f32.xlu1 %v692_v10  ;;  %v696_v42 = vmul.f32 %v2553_v40, %v2553_v40  ;;  %v695_v43 = vmul.f32 %v2556_v41, %v2556_v41  ;;  %v2563_v44 = vld [vmem:[%s2446_s29 + $0x258] sm:$0xff]  ;;  %v2566_v45 = vld [vmem:[%s2446_s29 + $0x248] sm:$0xff]  ;;  %p2220_p13 = pnand %p2219_p6, %p2213_p4 }
  0x63   : > { %755 = vadd.xlane.f32.xlu0 %v691_v11  ;;  %v728_v46 = vmul.f32 %v2563_v44, %v2563_v44  ;;  %v727_v47 = vmul.f32 %v2566_v45, %v2566_v45  ;;  %v2573_v48 = vld [vmem:[%s2446_s29 + $0x178] sm:$0xff]  ;;  %v2576_v49 = vld [vmem:[%s2446_s29 + $0x168] sm:$0xff] }
  0x64   : > { %v714_v50 = vmul.f32 %v2573_v48, %v2573_v48  ;;  %v713_v51 = vmul.f32 %v2576_v49, %v2576_v49  ;;  %v2583_v52 = vld [vmem:[%s2446_s29 + $0x378] sm:$0xff]  ;;  %v2586_v53 = vld [vmem:[%s2446_s29 + $0x368] sm:$0xff] }
  0x65   : > { %v746_v54 = vmul.f32 %v2583_v52, %v2583_v52  ;;  %v745_v55 = vmul.f32 %v2586_v53, %v2586_v53  ;;  %v2593_v56 = vld [vmem:[%s2446_s29 + $0x78] sm:$0xff]  ;;  %v2596_v57 = vld [vmem:[%s2446_s29 + $0x68] sm:$0xff] }
  0x66   : > { %821 = vadd.xlane.f32.xlu1 %v724_v14  ;;  %v698_v58 = vmul.f32 %v2593_v56, %v2593_v56  ;;  %v697_v59 = vmul.f32 %v2596_v57, %v2596_v57  ;;  %v2603_v60 = vld [vmem:[%s2446_s29 + $0x278] sm:$0xff]  ;;  %v2606_v61 = vld [vmem:[%s2446_s29 + $0x268] sm:$0xff] }
  0x67   : > { %819 = vadd.xlane.f32.xlu0 %v723_v15  ;;  %v730_v62 = vmul.f32 %v2603_v60, %v2603_v60  ;;  %v729_v63 = vmul.f32 %v2606_v61, %v2606_v61  ;;  %v2613_v3 = vld [vmem:[%s2446_s29 + $0x198] sm:$0xff]  ;;  %v2616_v4 = vld [vmem:[%s2446_s29 + $0x188] sm:$0xff] }
  0x68   : > { %v716_v6 = vmul.f32 %v2613_v3, %v2613_v3  ;;  %v715_v7 = vmul.f32 %v2616_v4, %v2616_v4  ;;  %v2623_v10 = vld [vmem:[%s2446_s29 + $0x398] sm:$0xff]  ;;  %v2626_v11 = vld [vmem:[%s2446_s29 + $0x388] sm:$0xff] }
  0x69   : > { %v748_v14 = vmul.f32 %v2623_v10, %v2623_v10  ;;  %v747_v15 = vmul.f32 %v2626_v11, %v2626_v11 }
  0x6a   : > { %793 = vadd.xlane.f32.xlu1 %v710_v18  ;;  %v2633_v18 = vld [vmem:[%s2446_s29 + $0x98] sm:$0xff] }
  0x6b   : > { %791 = vadd.xlane.f32.xlu0 %v709_v19  ;;  %v2636_v19 = vld [vmem:[%s2446_s29 + $0x88] sm:$0xff] }
  0x6e   : > { %857 = vadd.xlane.f32.xlu1 %v742_v22  ;;  %v700_v22 = vmul.f32 %v2633_v18, %v2633_v18 }
  0x6f   : > { %855 = vadd.xlane.f32.xlu0 %v741_v23  ;;  %v699_v23 = vmul.f32 %v2636_v19, %v2636_v19 }
  0x72   : > { %761 = vadd.xlane.f32.xlu1 %v694_v26  ;;  %v2643_v26 = vld [vmem:[%s2446_s29 + $0x298] sm:$0xff] }
  0x73   : > { %759 = vadd.xlane.f32.xlu0 %v693_v27  ;;  %v2646_v27 = vld [vmem:[%s2446_s29 + $0x288] sm:$0xff] }
  0x76   : > { %825 = vadd.xlane.f32.xlu1 %v726_v30  ;;  %v732_v30 = vmul.f32 %v2643_v26, %v2643_v26 }
  0x77   : > { %823 = vadd.xlane.f32.xlu0 %v725_v31  ;;  %v731_v31 = vmul.f32 %v2646_v27, %v2646_v27 }
  0x7a   : > { %797 = vadd.xlane.f32.xlu1 %v712_v34  ;;  %v2653_v34 = vld [vmem:[%s2446_s29 + $0x1b8] sm:$0xff] }
  0x7b   : > { %795 = vadd.xlane.f32.xlu0 %v711_v35  ;;  %v2656_v35 = vld [vmem:[%s2446_s29 + $0x1a8] sm:$0xff] }
  0x7e   : > { %861 = vadd.xlane.f32.xlu1 %v744_v38  ;;  %v718_v38 = vmul.f32 %v2653_v34, %v2653_v34 }
  0x7f   : > { %859 = vadd.xlane.f32.xlu0 %v743_v39  ;;  %v717_v39 = vmul.f32 %v2656_v35, %v2656_v35 }
  0x82   : > { %765 = vadd.xlane.f32.xlu1 %v696_v42  ;;  %v686_v42 = vld [vmem:[%s2446_s29 + $0x3b8] sm:$0xff] }
  0x83   : > { %763 = vadd.xlane.f32.xlu0 %v695_v43  ;;  %v685_v43 = vld [vmem:[%s2446_s29 + $0x3a8] sm:$0xff] }
  0x86   : > { %829 = vadd.xlane.f32.xlu1 %v728_v46  ;;  %v750_v46 = vmul.f32 %v686_v42, %v686_v42 }
  0x87   : > { %827 = vadd.xlane.f32.xlu0 %v727_v47  ;;  %v749_v47 = vmul.f32 %v685_v43, %v685_v43 }
  0x8a   : > { %801 = vadd.xlane.f32.xlu1 %v714_v50  ;;  %v638_v50 = vld [vmem:[%s2446_s29 + $0xb8] sm:$0xff] }
  0x8b   : > { %799 = vadd.xlane.f32.xlu0 %v713_v51  ;;  %v637_v51 = vld [vmem:[%s2446_s29 + $0xa8] sm:$0xff] }
  0x8e   : > { %865 = vadd.xlane.f32.xlu1 %v746_v54  ;;  %v702_v54 = vmul.f32 %v638_v50, %v638_v50 }
  0x8f   : > { %863 = vadd.xlane.f32.xlu0 %v745_v55  ;;  %v701_v55 = vmul.f32 %v637_v51, %v637_v51 }
  0x92   : > { %769 = vadd.xlane.f32.xlu1 %v698_v58  ;;  %v670_v58 = vld [vmem:[%s2446_s29 + $0x2b8] sm:$0xff] }
  0x93   : > { %767 = vadd.xlane.f32.xlu0 %v697_v59  ;;  %v669_v59 = vld [vmem:[%s2446_s29 + $0x2a8] sm:$0xff] }
  0x96   : > { %833 = vadd.xlane.f32.xlu1 %v730_v62  ;;  %v734_v62 = vmul.f32 %v670_v58, %v670_v58 }
  0x97   : > { %831 = vadd.xlane.f32.xlu0 %v729_v63  ;;  %v733_v63 = vmul.f32 %v669_v59, %v669_v59 }
  0x9a   : > { %805 = vadd.xlane.f32.xlu1 %v716_v6  ;;  %v656_v6 = vld [vmem:[%s2446_s29 + $0x1d8] sm:$0xff] }
  0x9b   : > { %803 = vadd.xlane.f32.xlu0 %v715_v7  ;;  %v655_v7 = vld [vmem:[%s2446_s29 + $0x1c8] sm:$0xff] }
  0x9e   : > { %869 = vadd.xlane.f32.xlu1 %v748_v14  ;;  %v720_v14 = vmul.f32 %v656_v6, %v656_v6 }
  0x9f   : > { %867 = vadd.xlane.f32.xlu0 %v747_v15  ;;  %v719_v15 = vmul.f32 %v655_v7, %v655_v7 }
  0xa2   : > { %773 = vadd.xlane.f32.xlu1 %v700_v22  ;;  %v688_v22 = vld [vmem:[%s2446_s29 + $0x3d8] sm:$0xff] }
  0xa3   : > { %771 = vadd.xlane.f32.xlu0 %v699_v23  ;;  %v687_v23 = vld [vmem:[%s2446_s29 + $0x3c8] sm:$0xff] }
  0xa6   : > { %837 = vadd.xlane.f32.xlu1 %v732_v30  ;;  %v752_v30 = vmul.f32 %v688_v22, %v688_v22 }
  0xa7   : > { %835 = vadd.xlane.f32.xlu0 %v731_v31  ;;  %v751_v31 = vmul.f32 %v687_v23, %v687_v23 }
  0xaa   : > { %809 = vadd.xlane.f32.xlu1 %v718_v38  ;;  %v640_v38 = vld [vmem:[%s2446_s29 + $0xd8] sm:$0xff] }
  0xab   : > { %807 = vadd.xlane.f32.xlu0 %v717_v39  ;;  %v639_v39 = vld [vmem:[%s2446_s29 + $0xc8] sm:$0xff]  ;;  %v704_v42 = vmul.f32 %v640_v38, %v640_v38 }
  0xac   : > { %v703_v43 = vmul.f32 %v639_v39, %v639_v39 }
  0xae   : > { %873 = vadd.xlane.f32.xlu1 %v750_v46  ;;  %v672_v46 = vld [vmem:[%s2446_s29 + $0x2d8] sm:$0xff] }
  0xaf   : > { %871 = vadd.xlane.f32.xlu0 %v749_v47  ;;  %v671_v47 = vld [vmem:[%s2446_s29 + $0x2c8] sm:$0xff]  ;;  %v736_v50 = vmul.f32 %v672_v46, %v672_v46 }
  0xb0   : > { %v735_v51 = vmul.f32 %v671_v47, %v671_v47 }
  0xb2   : > { %777 = vadd.xlane.f32.xlu1 %v702_v54  ;;  %v658_v54 = vld [vmem:[%s2446_s29 + $0x1f8] sm:$0xff] }
  0xb3   : > { %775 = vadd.xlane.f32.xlu0 %v701_v55  ;;  %v657_v55 = vld [vmem:[%s2446_s29 + $0x1e8] sm:$0xff]  ;;  %v722_v58 = vmul.f32 %v658_v54, %v658_v54 }
  0xb4   : > { %v721_v59 = vmul.f32 %v657_v55, %v657_v55 }
  0xb6   : > { %841 = vadd.xlane.f32.xlu1 %v734_v62  ;;  %v690_v62 = vld [vmem:[%s2446_s29 + $0x3f8] sm:$0xff] }
  0xb7   : > { %839 = vadd.xlane.f32.xlu0 %v733_v63  ;;  %v689_v63 = vld [vmem:[%s2446_s29 + $0x3e8] sm:$0xff]  ;;  %v754_v6 = vmul.f32 %v690_v62, %v690_v62 }
  0xb8   : > { %v753_v7 = vmul.f32 %v689_v63, %v689_v63 }
  0xba   : > { %813 = vadd.xlane.f32.xlu1 %v720_v14  ;;  %v642_v14 = vld [vmem:[%s2446_s29 + $0xf8] sm:$0xff] }
  0xbb   : > { %811 = vadd.xlane.f32.xlu0 %v719_v15  ;;  %v641_v15 = vld [vmem:[%s2446_s29 + $0xe8] sm:$0xff]  ;;  %v706_v22 = vmul.f32 %v642_v14, %v642_v14 }
  0xbc   : > { %v705_v23 = vmul.f32 %v641_v15, %v641_v15 }
  0xbe   : > { %877 = vadd.xlane.f32.xlu1 %v752_v30  ;;  %v674_v30 = vld [vmem:[%s2446_s29 + $0x2f8] sm:$0xff] }
  0xbf   : > { %875 = vadd.xlane.f32.xlu0 %v751_v31  ;;  %v673_v31 = vld [vmem:[%s2446_s29 + $0x2e8] sm:$0xff]  ;;  %v738_v38 = vmul.f32 %v674_v30, %v674_v30 }
  0xc0   : > { %v737_v39 = vmul.f32 %v673_v31, %v673_v31 }
  0xc2   : > { %781 = vadd.xlane.f32.xlu1 %v704_v42  ;;  %v195_v42 = vld [vmem:[%s2446_s29 + $0x110] sm:$0xff] }
  0xc3   : > { %779 = vadd.xlane.f32.xlu0 %v703_v43  ;;  %v194_v43 = vld [vmem:[%s2446_s29 + $0x100] sm:$0xff]  ;;  %v259_v46 = vmul.f32 %v195_v42, %v195_v42  ;;  %v229_v42 = vld [vmem:[%s2446_s29 + $0x330] sm:$0xff] }
  0xc4   : > { %v258_v47 = vmul.f32 %v194_v43, %v194_v43  ;;  %v228_v43 = vld [vmem:[%s2446_s29 + $0x320] sm:$0xff] }
  0xc6   : > { %845 = vadd.xlane.f32.xlu1 %v736_v50  ;;  %v227_v50 = vld [vmem:[%s2446_s29 + $0x310] sm:$0xff] }
  0xc7   : > { %843 = vadd.xlane.f32.xlu0 %v735_v51  ;;  %v226_v51 = vld [vmem:[%s2446_s29 + $0x300] sm:$0xff]  ;;  %v291_v54 = vmul.f32 %v227_v50, %v227_v50  ;;  %v293_v50 = vmul.f32 %v229_v42, %v229_v42 }
  0xc8   : > { %v290_v55 = vmul.f32 %v226_v51, %v226_v51  ;;  %v292_v51 = vmul.f32 %v228_v43, %v228_v43 }
  0xca   : > { %817 = vadd.xlane.f32.xlu1 %v722_v58  ;;  %v179_v58 = vld [vmem:[%s2446_s29 + $0x10] sm:$0xff] }
  0xcb   : > { %815 = vadd.xlane.f32.xlu0 %v721_v59  ;;  %v178_v59 = vld [vmem:[%s2446_s29] sm:$0xff]  ;;  %v243_v62 = vmul.f32 %v179_v58, %v179_v58  ;;  %v181_v58 = vld [vmem:[%s2446_s29 + $0x30] sm:$0xff] }
  0xcc   : > { %v242_v63 = vmul.f32 %v178_v59, %v178_v59  ;;  %v180_v59 = vld [vmem:[%s2446_s29 + $0x20] sm:$0xff] }
  0xce   : > { %881 = vadd.xlane.f32.xlu1 %v754_v6  ;;  %v211_v6 = vld [vmem:[%s2446_s29 + $0x210] sm:$0xff] }
  0xcf   : > { %879 = vadd.xlane.f32.xlu0 %v753_v7  ;;  %v210_v7 = vld [vmem:[%s2446_s29 + $0x200] sm:$0xff]  ;;  %v275_v14 = vmul.f32 %v211_v6, %v211_v6  ;;  %v245_v6 = vmul.f32 %v181_v58, %v181_v58 }
  0xd0   : > { %v274_v15 = vmul.f32 %v210_v7, %v210_v7  ;;  %v244_v7 = vmul.f32 %v180_v59, %v180_v59 }
  0xd2   : > { %785 = vadd.xlane.f32.xlu1 %v706_v22  ;;  %v197_v22 = vld [vmem:[%s2446_s29 + $0x130] sm:$0xff] }
  0xd3   : > { %783 = vadd.xlane.f32.xlu0 %v705_v23  ;;  %v196_v23 = vld [vmem:[%s2446_s29 + $0x120] sm:$0xff]  ;;  %v261_v30 = vmul.f32 %v197_v22, %v197_v22  ;;  %v213_v22 = vld [vmem:[%s2446_s29 + $0x230] sm:$0xff] }
  0xd4   : > { %v260_v31 = vmul.f32 %v196_v23, %v196_v23  ;;  %v212_v23 = vld [vmem:[%s2446_s29 + $0x220] sm:$0xff] }
  0xd6   : > { %849 = vadd.xlane.f32.xlu1 %v738_v38 }
  0xd7   : > { %847 = vadd.xlane.f32.xlu0 %v737_v39 }
  0xda   : > { %340 = vadd.xlane.f32.xlu1 %v259_v46 }
  0xdb   : > { %338 = vadd.xlane.f32.xlu0 %v258_v47 }
  0xde   : > { %404 = vadd.xlane.f32.xlu1 %v291_v54 }
  0xdf   : > { %402 = vadd.xlane.f32.xlu0 %v290_v55 }
  0xe2   : > { %308 = vadd.xlane.f32.xlu1 %v243_v62 }
  0xe3   : > { %306 = vadd.xlane.f32.xlu0 %v242_v63 }
  0xe6   : > { %372 = vadd.xlane.f32.xlu1 %v275_v14 }
  0xe7   : > { %370 = vadd.xlane.f32.xlu0 %v274_v15  ;;  %v852_v38 = vpop.xlane.xlu1 %851 }
  0xe8   : > { %v788_v39 = vpop.xlane.xlu0 %787  ;;  %v931_v46 = vmax.f32 %v852_v38, 1e-24  ;;  %v277_v38 = vmul.f32 %v213_v22, %v213_v22  ;;  %v230_v22 = vld [vmem:[%s2446_s29 + $0x340] sm:$0xff] }
  0xe9   : > { %v899_v47 = vmax.f32 %v788_v39, 1e-24  ;;  %v276_v39 = vmul.f32 %v212_v23, %v212_v23 }
  0xea   : > { %344 = vadd.xlane.f32.xlu1 %v261_v30  ;;  %1816 = vrsqrt.f32 %v931_v46  ;;  %v199_v46 = vld [vmem:[%s2446_s29 + $0x150] sm:$0xff] }
  0xeb   : > { %342 = vadd.xlane.f32.xlu0 %v260_v31  ;;  %v854_v54 = vpop.xlane.xlu1 %853  ;;  %1818 = vrsqrt.f32 %v899_v47  ;;  %v198_v47 = vld [vmem:[%s2446_s29 + $0x140] sm:$0xff] }
  0xec   : > { %v790_v55 = vpop.xlane.xlu0 %789  ;;  %v932_v62 = vmax.f32 %v854_v54, 1e-24  ;;  %v262_v58 = vmul.f32 %v198_v47, %v198_v47 }
  0xed   : > { %v900_v63 = vmax.f32 %v790_v55, 1e-24  ;;  %v263_v55 = vmul.f32 %v199_v46, %v199_v46 }
  0xee   : > { %1820 = vrsqrt.f32 %v932_v62  ;;  %408 = vadd.xlane.f32.xlu1 %v293_v50 }
  0xef   : > { %406 = vadd.xlane.f32.xlu0 %v292_v51  ;;  %1822 = vrsqrt.f32 %v900_v63  ;;  %v758_v14 = vpop.xlane.xlu1 %757 }
  0xf0   : > { %v756_v15 = vpop.xlane.xlu0 %755  ;;  %v884_v30 = vmax.f32 %v758_v14, 1e-24 }
  0xf1   : > { %v883_v31 = vmax.f32 %v756_v15, 1e-24 }
  0xf2   : > { %1824 = vrsqrt.f32 %v884_v30  ;;  %312 = vadd.xlane.f32.xlu1 %v245_v6  ;;  %v231_v6 = vld [vmem:[%s2446_s29 + $0x350] sm:$0xff] }
  0xf3   : > { %310 = vadd.xlane.f32.xlu0 %v244_v7  ;;  %1826 = vrsqrt.f32 %v883_v31  ;;  %v822_v42 = vpop.xlane.xlu1 %821 }
  0xf4   : > { %v820_v43 = vpop.xlane.xlu0 %819  ;;  %v916_v50 = vmax.f32 %v822_v42, 1e-24  ;;  %v1817_v54 = vpop.eup %1816  ;;  %v295_v42 = vmul.f32 %v231_v6, %v231_v6 }
  0xf5   : > { %v915_v51 = vmax.f32 %v820_v43, 1e-24  ;;  %v1819_v59 = vpop.eup %1818  ;;  %v1059_v30 = vmul.f32 %v1817_v54, %v2453_v0  ;;  %v182_v54 = vld [vmem:[%s2446_s29 + $0x40] sm:$0xff] }
  0xf6   : > { %1828 = vrsqrt.f32 %v916_v50  ;;  %376 = vadd.xlane.f32.xlu1 %v277_v38  ;;  %v1027_v38 = vmul.f32 %v1819_v59, %v2456_v1  ;;  %v294_v50 = vmul.f32 %v230_v22, %v230_v22  ;;  %v246_v6 = vmul.f32 %v182_v54, %v182_v54 }
  0xf7   : > { %374 = vadd.xlane.f32.xlu0 %v276_v39  ;;  %1830 = vrsqrt.f32 %v915_v51  ;;  %v794_v62 = vpop.xlane.xlu1 %793  ;;  %v183_v51 = vld [vmem:[%s2446_s29 + $0x50] sm:$0xff] }
  0xf8   : > { %v792_v63 = vpop.xlane.xlu0 %791  ;;  %v1821_v7 = vpop.eup %1820  ;;  %v902_v14 = vmax.f32 %v794_v62, 1e-24 }
  0xf9   : > { %v901_v15 = vmax.f32 %v792_v63, 1e-24  ;;  %v1823_v23 = vpop.eup %1822  ;;  %v1060_v31 = vmul.f32 %v1821_v7, %v2459_v2 }
  0xfa   : > { %1832 = vrsqrt.f32 %v902_v14  ;;  %348 = vadd.xlane.f32.xlu1 %v263_v55  ;;  %v1028_v39 = vmul.f32 %v1823_v23, %v2466_v5  ;;  %v247_v5 = vmul.f32 %v183_v51, %v183_v51  ;;  %v215_v14 = vld [vmem:[%s2446_s29 + $0x250] sm:$0xff] }
  0xfb   : > { %346 = vadd.xlane.f32.xlu0 %v262_v58  ;;  %1834 = vrsqrt.f32 %v901_v15  ;;  %v858_v43 = vpop.xlane.xlu1 %857  ;;  %v1657_v47 = vpack.c.bf16 %v1060_v31, %v1059_v30  ;;  %v214_v31 = vld [vmem:[%s2446_s29 + $0x240] sm:$0xff] }
  0xfc   : > { %v856_v46 = vpop.xlane.xlu0 %855  ;;  %v1825_v62 = vpop.eup %1824  ;;  %v934_v63 = vmax.f32 %v858_v43, 1e-24  ;;  %v1625_v2 = vpack.c.bf16 %v1028_v39, %v1027_v38 }
  0xfd   : > { %v933_v0 = vmax.f32 %v856_v46, 1e-24  ;;  %v1827_v7 = vpop.eup %1826  ;;  %1658 = vmatprep.subr.bf16.mxu1 %v1657_v47  ;;  %v1012_v55 = vmul.f32 %v1825_v62, %v2473_v8  ;;  %v2714_v8 = vld [vmem:[#allocation2 + $0x8] sm:$0xff]  ;;  %v278_v47 = vmul.f32 %v214_v31, %v214_v31 }
  0xfe   : > { %1836 = vrsqrt.f32 %v934_v63  ;;  %1626 = vmatprep.subr.bf16.mxu0 %v1625_v2  ;;  %412 = vadd.xlane.f32.xlu1 %v295_v42  ;;  %v1011_v1 = vmul.f32 %v1827_v7, %v2476_v9  ;;  %v279_v42 = vmul.f32 %v215_v14, %v215_v14 }
  0xff   : > { %1838 = vrsqrt.f32 %v933_v0  ;;  %410 = vadd.xlane.f32.xlu0 %v294_v50  ;;  %v762_v58 = vpop.xlane.xlu1 %761  ;;  %1521 = vmatprep.mubr.f32.mxu0 %v2714_v8  ;;  %v201_v50 = vld [vmem:[%s2446_s29 + $0x170] sm:$0xff]  ;;  %v200_v0 = vld [vmem:[%s2446_s29 + $0x160] sm:$0xff] }
 0x100   : > { %v760_v59 = vpop.xlane.xlu0 %759  ;;  %v1829_v15 = vpop.eup %1828  ;;  %v886_v22 = vmax.f32 %v762_v58, 1e-24  ;;  %v1627_v30 = vpack.c.bf16 %v1012_v55, %v1011_v1  ;;  %1555 = vmatprep.mubr.f32.mxu1 %v2714_v8  ;;  %v265_v7 = vmul.f32 %v201_v50, %v201_v50  ;;  %v233_v58 = vld [vmem:[%s2446_s29 + $0x370] sm:$0xff]  ;;  %v184_v50 = vld [vmem:[%s2446_s29 + $0x60] sm:$0xff] }
 0x101   : > { %v885_v23 = vmax.f32 %v760_v59, 1e-24  ;;  %v1831_v38 = vpop.eup %1830  ;;  %v1044_v39 = vmul.f32 %v1829_v15, %v2483_v12 }
 0x102   : > { %1840 = vrsqrt.f32 %v886_v22  ;;  %1628 = vmatpush3.bf16.xpose.msra.mxu0 %v1627_v30  ;;  %316 = vadd.xlane.f32.xlu1 %v247_v5  ;;  %v1043_v9 = vmul.f32 %v1831_v38, %v2486_v13  ;;  %v264_v5 = vmul.f32 %v200_v0, %v200_v0  ;;  %v232_v22 = vld [vmem:[%s2446_s29 + $0x360] sm:$0xff]  ;;  %v297_v30 = vmul.f32 %v233_v58, %v233_v58 }
 0x103   : > { %1842 = vrsqrt.f32 %v885_v23  ;;  %314 = vadd.xlane.f32.xlu0 %v246_v6  ;;  %v826_v43 = vpop.xlane.xlu1 %825  ;;  %v248_v0 = vmul.f32 %v184_v50, %v184_v50 }
 0x104   : > { %v824_v46 = vpop.xlane.xlu0 %823  ;;  %v1833_v51 = vpop.eup %1832  ;;  %v918_v62 = vmax.f32 %v826_v43, 1e-24  ;;  %v1659_v63 = vpack.c.bf16 %v1044_v39, %v1043_v9  ;;  %v296_v39 = vmul.f32 %v232_v22, %v232_v22  ;;  %v185_v9 = vld [vmem:[%s2446_s29 + $0x70] sm:$0xff] }
 0x105   : > { %v917_v12 = vmax.f32 %v824_v46, 1e-24  ;;  %v1835_v2 = vpop.eup %1834  ;;  %v1030_v54 = vmul.f32 %v1833_v51, %v2493_v16 }
 0x106   : > { %1844 = vrsqrt.f32 %v918_v62  ;;  %1660 = vmatpush3.bf16.xpose.msra.mxu1 %v1659_v63  ;;  %380 = vadd.xlane.f32.xlu1 %v279_v42  ;;  %v1029_v13 = vmul.f32 %v1835_v2, %v2496_v17  ;;  %v249_v62 = vmul.f32 %v185_v9, %v185_v9  ;;  %v217_v2 = vld [vmem:[%s2446_s29 + $0x270] sm:$0xff] }
 0x107   : > { %1846 = vrsqrt.f32 %v917_v12  ;;  %378 = vadd.xlane.f32.xlu0 %v278_v47  ;;  %v798_v55 = vpop.xlane.xlu1 %797  ;;  %v281_v58 = vmul.f32 %v217_v2, %v217_v2  ;;  %v187_v2 = vld [vmem:[%s2446_s29 + $0x90] sm:$0xff] }
 0x108   : > { %v796_v1 = vpop.xlane.xlu0 %795  ;;  %v1837_v59 = vpop.eup %1836  ;;  %v904_v6 = vmax.f32 %v798_v55, 1e-24  ;;  %v1629_v15 = vpack.c.bf16 %v1030_v54, %v1029_v13 }
 0x109   : > { %v903_v14 = vmax.f32 %v796_v1, 1e-24  ;;  %v1839_v16 = vpop.eup %1838  ;;  %v1062_v23 = vmul.f32 %v1837_v59, %v2503_v20  ;;  %v216_v1 = vld [vmem:[%s2446_s29 + $0x260] sm:$0xff] }
 0x10a   : > { %1848 = vrsqrt.f32 %v904_v6  ;;  %1630 = vmatprep.subr.bf16.mxu0 %v1629_v15  ;;  %352 = vadd.xlane.f32.xlu1 %v265_v7  ;;  %v1061_v17 = vmul.f32 %v1839_v16, %v2506_v21  ;;  %v203_v15 = vld [vmem:[%s2446_s29 + $0x190] sm:$0xff] }
 0x10b   : > { %1850 = vrsqrt.f32 %v903_v14  ;;  %350 = vadd.xlane.f32.xlu0 %v264_v5  ;;  %v862_v31 = vpop.xlane.xlu1 %861  ;;  %v280_v14 = vmul.f32 %v216_v1, %v216_v1  ;;  %v186_v1 = vld [vmem:[%s2446_s29 + $0x80] sm:$0xff] }
 0x10c   : > { %v860_v38 = vpop.xlane.xlu0 %859  ;;  %v1841_v42 = vpop.eup %1840  ;;  %v936_v43 = vmax.f32 %v862_v31, 1e-24  ;;  %v1661_v47 = vpack.c.bf16 %v1062_v23, %v1061_v17 }
 0x10d   : > { %v935_v46 = vmax.f32 %v860_v38, 1e-24  ;;  %v1843_v20 = vpop.eup %1842  ;;  %v1014_v51 = vmul.f32 %v1841_v42, %v2513_v24  ;;  %v267_v38 = vmul.f32 %v203_v15, %v203_v15 }
 0x10e   : > { %1852 = vrsqrt.f32 %v936_v43  ;;  %1662 = vmatprep.subr.bf16.mxu1 %v1661_v47  ;;  %416 = vadd.xlane.f32.xlu1 %v297_v30  ;;  %v1013_v21 = vmul.f32 %v1843_v20, %v2516_v25  ;;  %v202_v30 = vld [vmem:[%s2446_s29 + $0x180] sm:$0xff]  ;;  %v235_v43 = vld [vmem:[%s2446_s29 + $0x390] sm:$0xff] }
 0x10f   : > { %1854 = vrsqrt.f32 %v935_v46  ;;  %414 = vadd.xlane.f32.xlu0 %v296_v39  ;;  %v766_v12 = vpop.xlane.xlu1 %765  ;;  %v266_v42 = vmul.f32 %v202_v30, %v202_v30 }
 0x110   : > { %v764_v63 = vpop.xlane.xlu0 %763  ;;  %v1845_v54 = vpop.eup %1844  ;;  %v888_v13 = vmax.f32 %v766_v12, 1e-24  ;;  %v1631_v55 = vpack.c.bf16 %v1014_v51, %v1013_v21  ;;  %v234_v51 = vld [vmem:[%s2446_s29 + $0x380] sm:$0xff] }
 0x111   : > { %v887_v7 = vmax.f32 %v764_v63, 1e-24  ;;  %v1847_v24 = vpop.eup %1846  ;;  %v1046_v5 = vmul.f32 %v1845_v54, %v2523_v28 }
 0x112   : > { %1856 = vrsqrt.f32 %v888_v13  ;;  %1632 = vmatpush3.bf16.xpose.msra.mxu0 %v1631_v55  ;;  %320 = vadd.xlane.f32.xlu1 %v249_v62  ;;  %v1045_v25 = vmul.f32 %v1847_v24, %v2526_v29  ;;  %v299_v62 = vmul.f32 %v235_v43, %v235_v43 }
 0x113   : > { %1858 = vrsqrt.f32 %v887_v7  ;;  %318 = vadd.xlane.f32.xlu0 %v248_v0  ;;  %v830_v59 = vpop.xlane.xlu1 %829  ;;  %v298_v0 = vmul.f32 %v234_v51, %v234_v51 }
 0x114   : > { %v828_v6 = vpop.xlane.xlu0 %827  ;;  %v1849_v22 = vpop.eup %1848  ;;  %v920_v16 = vmax.f32 %v830_v59, 1e-24  ;;  %v1663_v17 = vpack.c.bf16 %v1046_v5, %v1045_v25  ;;  %v251_v5 = vmul.f32 %v187_v2, %v187_v2  ;;  %v250_v59 = vmul.f32 %v186_v1, %v186_v1  ;;  %v189_v1 = vld [vmem:[%s2446_s29 + $0xb0] sm:$0xff] }
 0x115   : > { %v919_v23 = vmax.f32 %v828_v6, 1e-24  ;;  %v1851_v28 = vpop.eup %1850  ;;  %v1032_v31 = vmul.f32 %v1849_v22, %v2533_v32  ;;  %v219_v6 = vld [vmem:[%s2446_s29 + $0x290] sm:$0xff] }
 0x116   : > { %1860 = vrsqrt.f32 %v920_v16  ;;  %1664 = vmatpush3.bf16.xpose.msra.mxu1 %v1663_v17  ;;  %384 = vadd.xlane.f32.xlu1 %v281_v58  ;;  %v1031_v29 = vmul.f32 %v1851_v28, %v2536_v33  ;;  %v283_v30 = vmul.f32 %v219_v6, %v219_v6 }
 0x117   : > { %1862 = vrsqrt.f32 %v919_v23  ;;  %382 = vadd.xlane.f32.xlu0 %v280_v14  ;;  %v802_v39 = vpop.xlane.xlu1 %801  ;;  %v218_v23 = vld [vmem:[%s2446_s29 + $0x280] sm:$0xff] }
 0x118   : > { %v800_v9 = vpop.xlane.xlu0 %799  ;;  %v1853_v46 = vpop.eup %1852  ;;  %v906_v47 = vmax.f32 %v802_v39, 1e-24  ;;  %v1633_v20 = vpack.c.bf16 %v1032_v31, %v1031_v29  ;;  %v282_v29 = vmul.f32 %v218_v23, %v218_v23 }
 0x119   : > { %v905_v50 = vmax.f32 %v800_v9, 1e-24  ;;  %v1855_v32 = vpop.eup %1854  ;;  %v1064_v21 = vmul.f32 %v1853_v46, %v2543_v36  ;;  %v204_v46 = vld [vmem:[%s2446_s29 + $0x1a0] sm:$0xff] }
 0x11a   : > { %1864 = vrsqrt.f32 %v906_v47  ;;  %1634 = vmatprep.subr.bf16.mxu0 %v1633_v20  ;;  %356 = vadd.xlane.f32.xlu1 %v267_v38  ;;  %v1063_v33 = vmul.f32 %v1855_v32, %v2546_v37  ;;  %v205_v38 = vld [vmem:[%s2446_s29 + $0x1b0] sm:$0xff]  ;;  %v268_v32 = vmul.f32 %v204_v46, %v204_v46 }
 0x11b   : > { %1866 = vrsqrt.f32 %v905_v50  ;;  %354 = vadd.xlane.f32.xlu0 %v266_v42  ;;  %v866_v12 = vpop.xlane.xlu1 %865  ;;  %v269_v50 = vmul.f32 %v205_v38, %v205_v38 }
 0x11c   : > { %v864_v63 = vpop.xlane.xlu0 %863  ;;  %v1857_v54 = vpop.eup %1856  ;;  %v938_v13 = vmax.f32 %v866_v12, 1e-24  ;;  %v1665_v55 = vpack.c.bf16 %v1064_v21, %v1063_v33  ;;  %v237_v21 = vld [vmem:[%s2446_s29 + $0x3b0] sm:$0xff] }
 0x11d   : > { %v937_v7 = vmax.f32 %v864_v63, 1e-24  ;;  %v1859_v36 = vpop.eup %1858  ;;  %v1016_v24 = vmul.f32 %v1857_v54, %v2553_v40  ;;  %v301_v54 = vmul.f32 %v237_v21, %v237_v21 }
 0x11e   : > { %1868 = vrsqrt.f32 %v938_v13  ;;  %1666 = vmatprep.subr.bf16.mxu1 %v1665_v55  ;;  %420 = vadd.xlane.f32.xlu1 %v299_v62  ;;  %v1015_v37 = vmul.f32 %v1859_v36, %v2556_v41 }
 0x11f   : > { %1870 = vrsqrt.f32 %v937_v7  ;;  %418 = vadd.xlane.f32.xlu0 %v298_v0  ;;  %v770_v25 = vpop.xlane.xlu1 %769  ;;  %v236_v0 = vld [vmem:[%s2446_s29 + $0x3a0] sm:$0xff] }
 0x120   : > { %v768_v58 = vpop.xlane.xlu0 %767  ;;  %v1861_v14 = vpop.eup %1860  ;;  %v890_v15 = vmax.f32 %v770_v25, 1e-24  ;;  %v1635_v16 = vpack.c.bf16 %v1016_v24, %v1015_v37  ;;  %v300_v55 = vmul.f32 %v236_v0, %v236_v0  ;;  %v188_v25 = vld [vmem:[%s2446_s29 + $0xa0] sm:$0xff] }
 0x121   : > { %v889_v22 = vmax.f32 %v768_v58, 1e-24  ;;  %v1863_v40 = vpop.eup %1862  ;;  %v1048_v17 = vmul.f32 %v1861_v14, %v2563_v44 }
 0x122   : > { %1872 = vrsqrt.f32 %v890_v15  ;;  %1636 = vmatpush3.bf16.xpose.msra.mxu0 %v1635_v16  ;;  %324 = vadd.xlane.f32.xlu1 %v251_v5  ;;  %v1047_v41 = vmul.f32 %v1863_v40, %v2566_v45  ;;  %v252_v15 = vmul.f32 %v188_v25, %v188_v25 }
 0x123   : > { %1874 = vrsqrt.f32 %v889_v22  ;;  %322 = vadd.xlane.f32.xlu0 %v250_v59  ;;  %v834_v28 = vpop.xlane.xlu1 %833  ;;  %v253_v59 = vmul.f32 %v189_v1, %v189_v1  ;;  %v221_v22 = vld [vmem:[%s2446_s29 + $0x2b0] sm:$0xff] }
 0x124   : > { %v832_v31 = vpop.xlane.xlu0 %831  ;;  %v1865_v39 = vpop.eup %1864  ;;  %v922_v9 = vmax.f32 %v834_v28, 1e-24  ;;  %v1667_v43 = vpack.c.bf16 %v1048_v17, %v1047_v41  ;;  %v220_v41 = vld [vmem:[%s2446_s29 + $0x2a0] sm:$0xff]  ;;  %v285_v28 = vmul.f32 %v221_v22, %v221_v22 }
 0x125   : > { %v921_v42 = vmax.f32 %v832_v31, 1e-24  ;;  %v1867_v44 = vpop.eup %1866  ;;  %v1034_v47 = vmul.f32 %v1865_v39, %v2573_v48  ;;  %v284_v38 = vmul.f32 %v220_v41, %v220_v41  ;;  %v207_v39 = vld [vmem:[%s2446_s29 + $0x1d0] sm:$0xff]  ;;  %v222_v22 = vld [vmem:[%s2446_s29 + $0x2c0] sm:$0xff] }
 0x126   : > { %1876 = vrsqrt.f32 %v922_v9  ;;  %1668 = vmatpush3.bf16.xpose.msra.mxu1 %v1667_v43  ;;  %388 = vadd.xlane.f32.xlu1 %v283_v30  ;;  %v1033_v45 = vmul.f32 %v1867_v44, %v2576_v49  ;;  %v206_v44 = vld [vmem:[%s2446_s29 + $0x1c0] sm:$0xff]  ;;  %v286_v41 = vmul.f32 %v222_v22, %v222_v22 }
 0x127   : > { %1878 = vrsqrt.f32 %v921_v42  ;;  %386 = vadd.xlane.f32.xlu0 %v282_v29  ;;  %v806_v20 = vpop.xlane.xlu1 %805 }
 0x128   : > { %v804_v51 = vpop.xlane.xlu0 %803  ;;  %v1869_v33 = vpop.eup %1868  ;;  %v908_v62 = vmax.f32 %v806_v20, 1e-24  ;;  %v1637_v63 = vpack.c.bf16 %v1034_v47, %v1033_v45  ;;  %v271_v45 = vmul.f32 %v207_v39, %v207_v39 }
 0x129   : > { %v907_v12 = vmax.f32 %v804_v51, 1e-24  ;;  %v1871_v48 = vpop.eup %1870  ;;  %v1066_v2 = vmul.f32 %v1869_v33, %v2583_v52  ;;  %v270_v51 = vmul.f32 %v206_v44, %v206_v44 }
 0x12a   : > { %1880 = vrsqrt.f32 %v908_v62  ;;  %1638 = vmatprep.subr.bf16.mxu0 %v1637_v63  ;;  %360 = vadd.xlane.f32.xlu1 %v269_v50  ;;  %v1065_v49 = vmul.f32 %v1871_v48, %v2586_v53  ;;  %v238_v63 = vld [vmem:[%s2446_s29 + $0x3c0] sm:$0xff] }
 0x12b   : > { %1882 = vrsqrt.f32 %v907_v12  ;;  %358 = vadd.xlane.f32.xlu0 %v268_v32  ;;  %v870_v13 = vpop.xlane.xlu1 %869  ;;  %v239_v32 = vld [vmem:[%s2446_s29 + $0x3d0] sm:$0xff] }
 0x12c   : > { %v868_v7 = vpop.xlane.xlu0 %867  ;;  %v1873_v36 = vpop.eup %1872  ;;  %v940_v24 = vmax.f32 %v870_v13, 1e-24  ;;  %v1669_v5 = vpack.c.bf16 %v1066_v2, %v1065_v49  ;;  %v303_v48 = vmul.f32 %v239_v32, %v239_v32  ;;  %v191_v13 = vld [vmem:[%s2446_s29 + $0xd0] sm:$0xff] }
 0x12d   : > { %v939_v37 = vmax.f32 %v868_v7, 1e-24  ;;  %v1875_v52 = vpop.eup %1874  ;;  %v1018_v58 = vmul.f32 %v1873_v36, %v2593_v56 }
 0x12e   : > { %1884 = vrsqrt.f32 %v940_v24  ;;  %1670 = vmatprep.subr.bf16.mxu1 %v1669_v5  ;;  %424 = vadd.xlane.f32.xlu1 %v301_v54  ;;  %v1017_v53 = vmul.f32 %v1875_v52, %v2596_v57  ;;  %v302_v54 = vmul.f32 %v238_v63, %v238_v63  ;;  %v190_v24 = vld [vmem:[%s2446_s29 + $0xc0] sm:$0xff]  ;;  %v255_v5 = vmul.f32 %v191_v13, %v191_v13  ;;  %v2075_v13 = vld [vmem:[%s2446_s29 + $0xa8] sm:$0xff] }
 0x12f   : > { %1886 = vrsqrt.f32 %v939_v37  ;;  %422 = vadd.xlane.f32.xlu0 %v300_v55  ;;  %v774_v6 = vpop.xlane.xlu1 %773 }
 0x130   : > { %v772_v14 = vpop.xlane.xlu0 %771  ;;  %v1877_v16 = vpop.eup %1876  ;;  %v892_v23 = vmax.f32 %v774_v6, 1e-24  ;;  %v1639_v17 = vpack.c.bf16 %v1018_v58, %v1017_v53  ;;  %v254_v58 = vmul.f32 %v190_v24, %v190_v24  ;;  %v223_v53 = vld [vmem:[%s2446_s29 + $0x2d0] sm:$0xff] }
 0x131   : > { %v891_v40 = vmax.f32 %v772_v14, 1e-24  ;;  %v1879_v56 = vpop.eup %1878  ;;  %v1050_v30 = vmul.f32 %v1877_v16, %v2603_v60 }
 0x132   : > { %1888 = vrsqrt.f32 %v892_v23  ;;  %1640 = vmatpush3.bf16.xpose.msra.mxu0 %v1639_v17  ;;  %328 = vadd.xlane.f32.xlu1 %v253_v59  ;;  %v1049_v57 = vmul.f32 %v1879_v56, %v2606_v61  ;;  %v287_v23 = vmul.f32 %v223_v53, %v223_v53  ;;  %v209_v56 = vld [vmem:[%s2446_s29 + $0x1f0] sm:$0xff]  ;;  %v2076_v53 = vld [vmem:[%s2446_s29 + $0x2b8] sm:$0xff] }
 0x133   : > { %1890 = vrsqrt.f32 %v891_v40  ;;  %326 = vadd.xlane.f32.xlu0 %v252_v15  ;;  %v838_v31 = vpop.xlane.xlu1 %837  ;;  %v273_v39 = vmul.f32 %v209_v56, %v209_v56  ;;  %v2078_v56 = vld [vmem:[%s2446_s29 + $0x1d8] sm:$0xff] }
 0x134   : > { %v836_v29 = vpop.xlane.xlu0 %835  ;;  %v1881_v9 = vpop.eup %1880  ;;  %v924_v42 = vmax.f32 %v838_v31, 1e-24  ;;  %v1671_v46 = vpack.c.bf16 %v1050_v30, %v1049_v57 }
 0x135   : > { %v923_v43 = vmax.f32 %v836_v29, 1e-24  ;;  %v1883_v60 = vpop.eup %1882  ;;  %v1036_v47 = vmul.f32 %v1881_v9, %v2613_v3  ;;  %v208_v29 = vld [vmem:[%s2446_s29 + $0x1e0] sm:$0xff] }
 0x136   : > { %1892 = vrsqrt.f32 %v924_v42  ;;  %1672 = vmatpush3.bf16.xpose.msra.mxu1 %v1671_v46  ;;  %392 = vadd.xlane.f32.xlu1 %v285_v28  ;;  %v1035_v61 = vmul.f32 %v1883_v60, %v2616_v4  ;;  %v2789_v46 = vld [vmem:[%s2446_s29 + $0x3f0] sm:$0xff] }
 0x137   : > { %1894 = vrsqrt.f32 %v923_v43  ;;  %390 = vadd.xlane.f32.xlu0 %v284_v38  ;;  %v810_v50 = vpop.xlane.xlu1 %809  ;;  %v272_v43 = vmul.f32 %v208_v29, %v208_v29  ;;  %v305_v32 = vmul.f32 %v2789_v46, %v2789_v46 }
 0x138   : > { %v808_v20 = vpop.xlane.xlu0 %807  ;;  %v1885_v21 = vpop.eup %1884  ;;  %v910_v33 = vmax.f32 %v810_v50, 1e-24  ;;  %v1641_v12 = vpack.c.bf16 %v1036_v47, %v1035_v61  ;;  %v2792_v61 = vld [vmem:[%s2446_s29 + $0x3e0] sm:$0xff]  ;;  %v2072_v50 = vld [vmem:[%s2446_s29 + $0x3b8] sm:$0xff] }
 0x139   : > { %v909_v62 = vmax.f32 %v808_v20, 1e-24  ;;  %v1887_v3 = vpop.eup %1886  ;;  %v1068_v0 = vmul.f32 %v1885_v21, %v2623_v10 }
 0x13a   : > { %1896 = vrsqrt.f32 %v910_v33  ;;  %1642 = vmatprep.subr.bf16.mxu0 %v1641_v12  ;;  %364 = vadd.xlane.f32.xlu1 %v271_v45  ;;  %v1067_v4 = vmul.f32 %v1887_v3, %v2626_v11  ;;  %v2801_v12 = vld [vmem:[%s2446_s29 + $0xf0] sm:$0xff] }
 0x13b   : > { %1898 = vrsqrt.f32 %v909_v62  ;;  %362 = vadd.xlane.f32.xlu0 %v270_v51  ;;  %v874_v2 = vpop.xlane.xlu1 %873  ;;  %v304_v62 = vmul.f32 %v2792_v61, %v2792_v61 }
 0x13c   : > { %v872_v49 = vpop.xlane.xlu0 %871  ;;  %v1889_v7 = vpop.eup %1888  ;;  %v942_v55 = vmax.f32 %v874_v2, 1e-24  ;;  %v1673_v36 = vpack.c.bf16 %v1068_v0, %v1067_v4 }
 0x13d   : > { %v941_v1 = vmax.f32 %v872_v49, 1e-24  ;;  %v1891_v10 = vpop.eup %1890  ;;  %v1020_v37 = vmul.f32 %v1889_v7, %v2633_v18  ;;  %v2074_v49 = vld [vmem:[%s2446_s29 + $0xb8] sm:$0xff] }
 0x13e   : > { %1900 = vrsqrt.f32 %v942_v55  ;;  %1674 = vmatprep.subr.bf16.mxu1 %v1673_v36  ;;  %428 = vadd.xlane.f32.xlu1 %v303_v48  ;;  %v1019_v11 = vmul.f32 %v1891_v10, %v2636_v19  ;;  %v2804_v48 = vld [vmem:[%s2446_s29 + $0xe0] sm:$0xff]  ;;  %v257_v55 = vmul.f32 %v2801_v12, %v2801_v12  ;;  %v2813_v10 = vld [vmem:[%s2446_s29 + $0x2f0] sm:$0xff] }
 0x13f   : > { %1902 = vrsqrt.f32 %v941_v1  ;;  %426 = vadd.xlane.f32.xlu0 %v302_v54  ;;  %v778_v25 = vpop.xlane.xlu1 %777  ;;  %v256_v24 = vmul.f32 %v2804_v48, %v2804_v48 }
 0x140   : > { %v776_v52 = vpop.xlane.xlu0 %775  ;;  %v1893_v59 = vpop.eup %1892  ;;  %v894_v6 = vmax.f32 %v778_v25, 1e-24  ;;  %v1643_v15 = vpack.c.bf16 %v1020_v37, %v1019_v11 }
 0x141   : > { %v893_v14 = vmax.f32 %v776_v52, 1e-24  ;;  %v1895_v18 = vpop.eup %1894  ;;  %v1052_v16 = vmul.f32 %v1893_v59, %v2643_v26  ;;  %v2816_v52 = vld [vmem:[%s2446_s29 + $0x2e0] sm:$0xff] }
 0x142   : > { %1904 = vrsqrt.f32 %v894_v6  ;;  %1644 = vmatpush3.bf16.xpose.msra.mxu0 %v1643_v15  ;;  %332 = vadd.xlane.f32.xlu1 %v255_v5  ;;  %v1051_v19 = vmul.f32 %v1895_v18, %v2646_v27  ;;  %v2077_v6 = vld [vmem:[%s2446_s29 + $0x2a8] sm:$0xff]  ;;  %v289_v15 = vmul.f32 %v2813_v10, %v2813_v10 }
 0x143   : > { %1906 = vrsqrt.f32 %v893_v14  ;;  %330 = vadd.xlane.f32.xlu0 %v254_v58  ;;  %v842_v40 = vpop.xlane.xlu1 %841 }
 0x144   : > { %v840_v17 = vpop.xlane.xlu0 %839  ;;  %v1897_v30 = vpop.eup %1896  ;;  %v926_v57 = vmax.f32 %v842_v40, 1e-24  ;;  %v1675_v31 = vpack.c.bf16 %v1052_v16, %v1051_v19  ;;  %v288_v16 = vmul.f32 %v2816_v52, %v2816_v52 }
 0x145   : > { %v925_v28 = vmax.f32 %v840_v17, 1e-24  ;;  %v1899_v26 = vpop.eup %1898  ;;  %v1038_v38 = vmul.f32 %v1897_v30, %v2653_v34 }
 0x146   : > { %1908 = vrsqrt.f32 %v926_v57  ;;  %1676 = vmatpush3.bf16.xpose.msra.mxu1 %v1675_v31  ;;  %396 = vadd.xlane.f32.xlu1 %v287_v23  ;;  %v1037_v27 = vmul.f32 %v1899_v26, %v2656_v35  ;;  %v2073_v35 = vld [vmem:[%s2446_s29 + $0x3a8] sm:$0xff] }
 0x147   : > { %1910 = vrsqrt.f32 %v925_v28  ;;  %394 = vadd.xlane.f32.xlu0 %v286_v41  ;;  %v814_v9 = vpop.xlane.xlu1 %813  ;;  %v2079_v57 = vld [vmem:[%s2446_s29 + $0x1c8] sm:$0xff] }
 0x148   : > { %v812_v42 = vpop.xlane.xlu0 %811  ;;  %v1901_v44 = vpop.eup %1900  ;;  %v912_v60 = vmax.f32 %v814_v9, 1e-24  ;;  %v1645_v34 = vpack.c.bf16 %v1038_v38, %v1037_v27 }
 0x149   : > { %v911_v47 = vmax.f32 %v812_v42, 1e-24  ;;  %v1903_v45 = vpop.eup %1902  ;;  %v1070_v20 = vmul.f32 %v2072_v50, %v1901_v44  ;;  %v2080_v42 = vld [vmem:[%s2446_s29 + $0x3d8] sm:$0xff]  ;;  %v2081_v44 = vld [vmem:[%s2446_s29 + $0x3c8] sm:$0xff] }
 0x14a   : > { %1912 = vrsqrt.f32 %v912_v60  ;;  %1646 = vmatprep.subr.bf16.mxu0 %v1645_v34  ;;  %368 = vadd.xlane.f32.xlu1 %v273_v39  ;;  %v1069_v51 = vmul.f32 %v2073_v35, %v1903_v45 }
 0x14b   : > { %1914 = vrsqrt.f32 %v911_v47  ;;  %366 = vadd.xlane.f32.xlu0 %v272_v43  ;;  %v878_v21 = vpop.xlane.xlu1 %877 }
 0x14c   : > { %v876_v33 = vpop.xlane.xlu0 %875  ;;  %v1905_v63 = vpop.eup %1904  ;;  %v944_v3 = vmax.f32 %v878_v21, 1e-24  ;;  %v1677_v4 = vpack.c.bf16 %v1070_v20, %v1069_v51 }
 0x14d   : > { %v943_v0 = vmax.f32 %v876_v33, 1e-24  ;;  %v1907_v2 = vpop.eup %1906  ;;  %v1022_v54 = vmul.f32 %v2074_v49, %v1905_v63  ;;  %v2083_v33 = vld [vmem:[%s2446_s29 + $0xc8] sm:$0xff] }
 0x14e   : > { %1916 = vrsqrt.f32 %v944_v3  ;;  %1678 = vmatprep.subr.bf16.mxu1 %v1677_v4  ;;  %432 = vadd.xlane.f32.xlu1 %v305_v32  ;;  %v1021_v7 = vmul.f32 %v2075_v13, %v1907_v2  ;;  %v2082_v32 = vld [vmem:[%s2446_s29 + $0xd8] sm:$0xff] }
 0x14f   : > { %1918 = vrsqrt.f32 %v943_v0  ;;  %430 = vadd.xlane.f32.xlu0 %v304_v62  ;;  %v782_v1 = vpop.xlane.xlu1 %781  ;;  %v2084_v13 = vld [vmem:[%s2446_s29 + $0x2d8] sm:$0xff] }
 0x150   : > { %v780_v36 = vpop.xlane.xlu0 %779  ;;  %v1909_v37 = vpop.eup %1908  ;;  %v896_v11 = vmax.f32 %v782_v1, 1e-24  ;;  %v1647_v25 = vpack.c.bf16 %v1022_v54, %v1021_v7 }
 0x151   : > { %v895_v5 = vmax.f32 %v780_v36, 1e-24  ;;  %v1911_v58 = vpop.eup %1910  ;;  %v1054_v59 = vmul.f32 %v2076_v53, %v1909_v37  ;;  %v2086_v53 = vld [vmem:[%s2446_s29 + $0x1f8] sm:$0xff] }
 0x152   : > { %1920 = vrsqrt.f32 %v896_v11  ;;  %1648 = vmatpush3.bf16.xpose.msra.mxu0 %v1647_v25  ;;  %336 = vadd.xlane.f32.xlu1 %v257_v55  ;;  %v1053_v14 = vmul.f32 %v2077_v6, %v1911_v58  ;;  %v2085_v55 = vld [vmem:[%s2446_s29 + $0x2c8] sm:$0xff] }
 0x153   : > { %1922 = vrsqrt.f32 %v895_v5  ;;  %334 = vadd.xlane.f32.xlu0 %v256_v24  ;;  %v846_v22 = vpop.xlane.xlu1 %845  ;;  %v2087_v6 = vld [vmem:[%s2446_s29 + $0x1e8] sm:$0xff] }
 0x154   : > { %v844_v18 = vpop.xlane.xlu0 %843  ;;  %v1913_v19 = vpop.eup %1912  ;;  %v928_v23 = vmax.f32 %v846_v22, 1e-24  ;;  %v1679_v17 = vpack.c.bf16 %v1054_v59, %v1053_v14 }
 0x155   : > { %v927_v40 = vmax.f32 %v844_v18, 1e-24  ;;  %v1915_v41 = vpop.eup %1914  ;;  %v1040_v30 = vmul.f32 %v2078_v56, %v1913_v19  ;;  %v2089_v56 = vld [vmem:[%s2446_s29 + $0x3e8] sm:$0xff] }
 0x156   : > { %1924 = vrsqrt.f32 %v928_v23  ;;  %1680 = vmatpush3.bf16.xpose.msra.mxu1 %v1679_v17  ;;  %400 = vadd.xlane.f32.xlu1 %v289_v15  ;;  %v1039_v28 = vmul.f32 %v2079_v57, %v1915_v41  ;;  %v2088_v17 = vld [vmem:[%s2446_s29 + $0x3f8] sm:$0xff] }
 0x157   : > { %1926 = vrsqrt.f32 %v927_v40  ;;  %398 = vadd.xlane.f32.xlu0 %v288_v16  ;;  %v818_v31 = vpop.xlane.xlu1 %817 }
 0x158   : > { %v816_v29 = vpop.xlane.xlu0 %815  ;;  %v1917_v26 = vpop.eup %1916  ;;  %v914_v38 = vmax.f32 %v818_v31, 1e-24  ;;  %v1649_v39 = vpack.c.bf16 %v1040_v30, %v1039_v28 }
 0x159   : > { %v913_v27 = vmax.f32 %v816_v29, 1e-24  ;;  %v1919_v9 = vpop.eup %1918  ;;  %v1072_v43 = vmul.f32 %v2080_v42, %v1917_v26  ;;  %v2091_v42 = vld [vmem:[%s2446_s29 + $0xe8] sm:$0xff] }
 0x15a   : > { %1928 = vrsqrt.f32 %v914_v38  ;;  %1650 = vmatprep.subr.bf16.mxu0 %v1649_v39  ;;  %v1071_v60 = vmul.f32 %v2081_v44, %v1919_v9  ;;  %v2090_v39 = vld [vmem:[%s2446_s29 + $0xf8] sm:$0xff] }
 0x15b   : > { %1930 = vrsqrt.f32 %v913_v27  ;;  %v882_v47 = vpop.xlane.xlu1 %881 }
 0x15c   : > { %v880_v34 = vpop.xlane.xlu0 %879  ;;  %v1921_v45 = vpop.eup %1920  ;;  %v946_v50 = vmax.f32 %v882_v47, 1e-24  ;;  %v1681_v35 = vpack.c.bf16 %v1072_v43, %v1071_v60 }
 0x15d   : > { %v945_v20 = vmax.f32 %v880_v34, 1e-24  ;;  %v1923_v51 = vpop.eup %1922  ;;  %v1024_v21 = vmul.f32 %v2082_v32, %v1921_v45  ;;  %v2093_v32 = vld [vmem:[%s2446_s29 + $0x2e8] sm:$0xff] }
 0x15e   : > { %1932 = vrsqrt.f32 %v946_v50  ;;  %1682 = vmatprep.subr.bf16.mxu1 %v1681_v35  ;;  %v1023_v62 = vmul.f32 %v2083_v33, %v1923_v51  ;;  %v2092_v35 = vld [vmem:[%s2446_s29 + $0x2f8] sm:$0xff] }
 0x15f   : > { %1934 = vrsqrt.f32 %v945_v20  ;;  %v786_v63 = vpop.xlane.xlu1 %785 }
 0x160   : > { %v784_v3 = vpop.xlane.xlu0 %783  ;;  %v1925_v0 = vpop.eup %1924  ;;  %v898_v4 = vmax.f32 %v786_v63, 1e-24  ;;  %v1651_v49 = vpack.c.bf16 %v1024_v21, %v1023_v62 }
 0x161   : > { %v897_v2 = vmax.f32 %v784_v3, 1e-24  ;;  %v1927_v54 = vpop.eup %1926  ;;  %v1056_v7 = vmul.f32 %v2084_v13, %v1925_v0  ;;  %v2095_v13 = vld [vmem:[%s2446_s29 + $0x100] sm:$0xff] }
 0x162   : > { %1936 = vrsqrt.f32 %v898_v4  ;;  %1652 = vmatpush3.bf16.xpose.msra.mxu0 %v1651_v49  ;;  %v1055_v1 = vmul.f32 %v2085_v55, %v1927_v54  ;;  %v2094_v49 = vld [vmem:[%s2446_s29 + $0x110] sm:$0xff] }
 0x163   : > { %1938 = vrsqrt.f32 %v897_v2  ;;  %v850_v36 = vpop.xlane.xlu1 %849 }
 0x164   : > { %v848_v24 = vpop.xlane.xlu0 %847  ;;  %v1929_v37 = vpop.eup %1928  ;;  %v930_v11 = vmax.f32 %v850_v36, 1e-24  ;;  %v1683_v25 = vpack.c.bf16 %v1056_v7, %v1055_v1  ;;  %v2842_v36 = vld [vmem:[#allocation2] sm:$0xff] }
 0x165   : > { %v929_v5 = vmax.f32 %v848_v24, 1e-24  ;;  %v1931_v58 = vpop.eup %1930  ;;  %v1042_v59 = vmul.f32 %v2086_v53, %v1929_v37 }
 0x166   : > { %1940 = vrsqrt.f32 %v930_v11  ;;  %1684 = vmatpush3.bf16.xpose.msra.mxu1 %v1683_v25  ;;  %v1041_v14 = vmul.f32 %v2087_v6, %v1931_v58  ;;  %v2096_v58 = vld [vmem:[%s2446_s29 + $0x310] sm:$0xff] }
 0x167   : > { %1942 = vrsqrt.f32 %v929_v5  ;;  %v341_v15 = vpop.xlane.xlu1 %340 }
 0x168   : > { %v339_v22 = vpop.xlane.xlu0 %338  ;;  %v1933_v18 = vpop.eup %1932  ;;  %v451_v16 = vmax.f32 %v341_v15, 1e-24  ;;  %v1653_v23 = vpack.c.bf16 %v1042_v59, %v1041_v14  ;;  %v2097_v59 = vld [vmem:[%s2446_s29 + $0x300] sm:$0xff] }
 0x169   : > { %v450_v19 = vmax.f32 %v339_v22, 1e-24  ;;  %v1935_v40 = vpop.eup %1934  ;;  %v1074_v41 = vmul.f32 %v2088_v17, %v1933_v18 }
 0x16a   : > { %1944 = vrsqrt.f32 %v451_v16  ;;  %1654 = vmatprep.subr.bf16.mxu0 %v1653_v23  ;;  %v1073_v30 = vmul.f32 %v2089_v56, %v1935_v40  ;;  %v2098_v40 = vld [vmem:[%s2446_s29 + $0x10] sm:$0xff] }
 0x16b   : > { %1946 = vrsqrt.f32 %v450_v19  ;;  %v405_v57 = vpop.xlane.xlu1 %404 }
 0x16c   : > { %v403_v28 = vpop.xlane.xlu0 %402  ;;  %v1937_v31 = vpop.eup %1936  ;;  %v483_v29 = vmax.f32 %v405_v57, 1e-24  ;;  %v1685_v38 = vpack.c.bf16 %v1074_v41, %v1073_v30  ;;  %v2099_v41 = vld [vmem:[%s2446_s29] sm:$0xff] }
 0x16d   : > { %v482_v26 = vmax.f32 %v403_v28, 1e-24  ;;  %v1939_v27 = vpop.eup %1938  ;;  %v1026_v9 = vmul.f32 %v2090_v39, %v1937_v31 }
 0x16e   : > { %1948 = vrsqrt.f32 %v483_v29  ;;  %1686 = vmatprep.subr.bf16.mxu1 %v1685_v38  ;;  %v1025_v43 = vmul.f32 %v2091_v42, %v1939_v27  ;;  %v2100_v27 = vld [vmem:[%s2446_s29 + $0x210] sm:$0xff] }
 0x16f   : > { %1950 = vrsqrt.f32 %v482_v26  ;;  %v309_v44 = vpop.xlane.xlu1 %308 }
 0x170   : > { %v307_v60 = vpop.xlane.xlu0 %306  ;;  %v1941_v47 = vpop.eup %1940  ;;  %v435_v34 = vmax.f32 %v309_v44, 1e-24  ;;  %v1655_v50 = vpack.c.bf16 %v1026_v9, %v1025_v43 }
 0x171   : > { %v434_v45 = vmax.f32 %v307_v60, 1e-24  ;;  %v1943_v20 = vpop.eup %1942  ;;  %v1058_v51 = vmul.f32 %v2092_v35, %v1941_v47  ;;  %v2103_v35 = vld [vmem:[%s2446_s29 + $0x120] sm:$0xff] }
 0x172   : > { %1952 = vrsqrt.f32 %v435_v34  ;;  %1656 = vmatpush3.bf16.xpose.msra.mxu0 %v1655_v50  ;;  %v1057_v21 = vmul.f32 %v2093_v32, %v1943_v20  ;;  %v2102_v50 = vld [vmem:[%s2446_s29 + $0x130] sm:$0xff] }
 0x173   : > { %1954 = vrsqrt.f32 %v434_v45  ;;  %v373_v33 = vpop.xlane.xlu1 %372 }
 0x174   : > { %v371_v62 = vpop.xlane.xlu0 %370  ;;  %v1945_v63 = vpop.eup %1944  ;;  %v467_v3 = vmax.f32 %v373_v33, 1e-24  ;;  %v1687_v4 = vpack.c.bf16 %v1058_v51, %v1057_v21 }
 0x175   : > { %v466_v0 = vmax.f32 %v371_v62, 1e-24  ;;  %v1947_v2 = vpop.eup %1946  ;;  %v579_v54 = vmul.f32 %v2094_v49, %v1945_v63  ;;  %v2105_v49 = vld [vmem:[%s2446_s29 + $0x320] sm:$0xff] }
 0x176   : > { %1956 = vrsqrt.f32 %v467_v3  ;;  %1688 = vmatpush3.bf16.xpose.msra.mxu1 %v1687_v4  ;;  %v578_v7 = vmul.f32 %v2095_v13, %v1947_v2  ;;  %v2104_v4 = vld [vmem:[%s2446_s29 + $0x330] sm:$0xff] }
 0x177   : > { %1958 = vrsqrt.f32 %v466_v0  ;;  %v345_v55 = vpop.xlane.xlu1 %344 }
 0x178   : > { %v343_v1 = vpop.xlane.xlu0 %342  ;;  %v1949_v24 = vpop.eup %1948  ;;  %v453_v37 = vmax.f32 %v345_v55, 1e-24  ;;  %v1689_v5 = vpack.c.bf16 %v579_v54, %v578_v7 }
 0x179   : > { %v452_v11 = vmax.f32 %v343_v1, 1e-24  ;;  %v1951_v25 = vpop.eup %1950  ;;  %v611_v53 = vmul.f32 %v2096_v58, %v1949_v24  ;;  %1522 = vmatmul.mubr.f32.vlgmr.msra.gmra.mrb[0].mxu0 %v2714_v8  ;;  %v2107_v58 = vld [vmem:[%s2446_s29 + $0x20] sm:$0xff] }
 0x17a   : > { %1960 = vrsqrt.f32 %v453_v37  ;;  %1690 = vmatprep.subr.bf16.mxu0 %v1689_v5  ;;  %v610_v6 = vmul.f32 %v2097_v59, %v1951_v25  ;;  %1589 = vmatprep.mubr.f32.mxu0 %v2842_v36  ;;  %v2106_v5 = vld [vmem:[%s2446_s29 + $0x30] sm:$0xff] }
 0x17b   : > { %1962 = vrsqrt.f32 %v452_v11  ;;  %v409_v14 = vpop.xlane.xlu1 %408 }
 0x17c   : > { %v407_v15 = vpop.xlane.xlu0 %406  ;;  %v1953_v22 = vpop.eup %1952  ;;  %v485_v18 = vmax.f32 %v409_v14, 1e-24  ;;  %v1721_v19 = vpack.c.bf16 %v611_v53, %v610_v6 }
 0x17d   : > { %v484_v16 = vmax.f32 %v407_v15, 1e-24  ;;  %v1955_v23 = vpop.eup %1954  ;;  %v563_v17 = vmul.f32 %v2098_v40, %v1953_v22  ;;  %1556 = vmatmul.mubr.f32.vlgmr.msra.gmra.mrb[0].mxu1 %v2714_v8  ;;  %v2101_v8 = vld [vmem:[%s2446_s29 + $0x200] sm:$0xff] }
 0x17e   : > { %1964 = vrsqrt.f32 %v485_v18  ;;  %1722 = vmatprep.subr.bf16.mxu1 %v1721_v19  ;;  %v562_v56 = vmul.f32 %v2099_v41, %v1955_v23  ;;  %1623 = vmatprep.mubr.f32.mxu1 %v2842_v36  ;;  %v2108_v19 = vld [vmem:[%s2446_s29 + $0x230] sm:$0xff]  ;;  %v2109_v40 = vld [vmem:[%s2446_s29 + $0x220] sm:$0xff] }
 0x17f   : > { %1966 = vrsqrt.f32 %v484_v16  ;;  %v313_v30 = vpop.xlane.xlu1 %312 }
 0x180   : > { %v311_v57 = vpop.xlane.xlu0 %310  ;;  %v1957_v28 = vpop.eup %1956  ;;  %v437_v31 = vmax.f32 %v313_v30, 1e-24  ;;  %v1691_v26 = vpack.c.bf16 %v563_v17, %v562_v56 }
 0x181   : > { %v436_v29 = vmax.f32 %v311_v57, 1e-24  ;;  %v1959_v38 = vpop.eup %1958  ;;  %v595_v39 = vmul.f32 %v2100_v27, %v1957_v28  ;;  %v2111_v27 = vld [vmem:[%s2446_s29 + $0x140] sm:$0xff] }
 0x182   : > { %1968 = vrsqrt.f32 %v437_v31  ;;  %1692 = vmatpush3.bf16.xpose.msra.mxu0 %v1691_v26  ;;  %v594_v9 = vmul.f32 %v2101_v8, %v1959_v38  ;;  %v2110_v26 = vld [vmem:[%s2446_s29 + $0x150] sm:$0xff] }
 0x183   : > { %1970 = vrsqrt.f32 %v436_v29  ;;  %v377_v42 = vpop.xlane.xlu1 %376 }
 0x184   : > { %v375_v43 = vpop.xlane.xlu0 %374  ;;  %v1961_v44 = vpop.eup %1960  ;;  %v469_v60 = vmax.f32 %v377_v42, 1e-24  ;;  %v1723_v34 = vpack.c.bf16 %v595_v39, %v594_v9 }
 0x185   : > { %v468_v47 = vmax.f32 %v375_v43, 1e-24  ;;  %v1963_v45 = vpop.eup %1962  ;;  %v581_v20 = vmul.f32 %v2102_v50, %v1961_v44  ;;  %v2113_v50 = vld [vmem:[%s2446_s29 + $0x340] sm:$0xff] }
 0x186   : > { %1972 = vrsqrt.f32 %v469_v60  ;;  %1724 = vmatpush3.bf16.xpose.msra.mxu1 %v1723_v34  ;;  %v580_v51 = vmul.f32 %v2103_v35, %v1963_v45  ;;  %v2112_v34 = vld [vmem:[%s2446_s29 + $0x350] sm:$0xff] }
 0x187   : > { %1974 = vrsqrt.f32 %v468_v47  ;;  %v349_v32 = vpop.xlane.xlu1 %348 }
 0x188   : > { %v347_v21 = vpop.xlane.xlu0 %346  ;;  %v1965_v33 = vpop.eup %1964  ;;  %v455_v62 = vmax.f32 %v349_v32, 1e-24  ;;  %v1693_v3 = vpack.c.bf16 %v581_v20, %v580_v51 }
 0x189   : > { %v454_v63 = vmax.f32 %v347_v21, 1e-24  ;;  %v1967_v0 = vpop.eup %1966  ;;  %v613_v2 = vmul.f32 %v2104_v4, %v1965_v33  ;;  %v2115_v4 = vld [vmem:[%s2446_s29 + $0x40] sm:$0xff] }
 0x18a   : > { %1976 = vrsqrt.f32 %v455_v62  ;;  %1694 = vmatprep.subr.bf16.mxu0 %v1693_v3  ;;  %v612_v54 = vmul.f32 %v2105_v49, %v1967_v0  ;;  %v2114_v3 = vld [vmem:[%s2446_s29 + $0x50] sm:$0xff] }
 0x18b   : > { %1978 = vrsqrt.f32 %v454_v63  ;;  %v413_v13 = vpop.xlane.xlu1 %412 }
 0x18c   : > { %v1969_v7 = vpop.eup %1968  ;;  %v487_v55 = vmax.f32 %v413_v13, 1e-24  ;;  %v411_v1 = vpop.xlane.xlu0 %410  ;;  %v1725_v24 = vpack.c.bf16 %v613_v2, %v612_v54 }
 0x18d   : > { %v1971_v37 = vpop.eup %1970  ;;  %v486_v11 = vmax.f32 %v411_v1, 1e-24  ;;  %v565_v25 = vmul.f32 %v2106_v5, %v1969_v7  ;;  %v2117_v5 = vld [vmem:[%s2446_s29 + $0x240] sm:$0xff] }
 0x18e   : > { %1980 = vrsqrt.f32 %v487_v55  ;;  %1726 = vmatprep.subr.bf16.mxu1 %v1725_v24  ;;  %v564_v53 = vmul.f32 %v2107_v58, %v1971_v37  ;;  %v2116_v37 = vld [vmem:[%s2446_s29 + $0x250] sm:$0xff] }
 0x18f   : > { %1982 = vrsqrt.f32 %v486_v11  ;;  %v317_v59 = vpop.xlane.xlu1 %316 }
 0x190   : > { %v1973_v6 = vpop.eup %1972  ;;  %v439_v14 = vmax.f32 %v317_v59, 1e-24  ;;  %v315_v15 = vpop.xlane.xlu0 %314  ;;  %v1695_v22 = vpack.c.bf16 %v565_v25, %v564_v53 }
 0x191   : > { %v1975_v18 = vpop.eup %1974  ;;  %v438_v16 = vmax.f32 %v315_v15, 1e-24  ;;  %v597_v23 = vmul.f32 %v2108_v19, %v1973_v6  ;;  %v2119_v19 = vld [vmem:[%s2446_s29 + $0x160] sm:$0xff] }
 0x192   : > { %1984 = vrsqrt.f32 %v439_v14  ;;  %1696 = vmatpush3.bf16.xpose.msra.mxu0 %v1695_v22  ;;  %v596_v17 = vmul.f32 %v2109_v40, %v1975_v18  ;;  %v2118_v18 = vld [vmem:[%s2446_s29 + $0x170] sm:$0xff] }
 0x193   : > { %1986 = vrsqrt.f32 %v438_v16  ;;  %v381_v41 = vpop.xlane.xlu1 %380 }
 0x194   : > { %v1977_v56 = vpop.eup %1976  ;;  %v471_v30 = vmax.f32 %v381_v41, 1e-24  ;;  %v379_v57 = vpop.xlane.xlu0 %378  ;;  %v1727_v28 = vpack.c.bf16 %v597_v23, %v596_v17 }
 0x195   : > { %v1979_v31 = vpop.eup %1978  ;;  %v470_v29 = vmax.f32 %v379_v57, 1e-24  ;;  %v583_v38 = vmul.f32 %v2110_v26, %v1977_v56  ;;  %v2121_v26 = vld [vmem:[%s2446_s29 + $0x360] sm:$0xff] }
 0x196   : > { %1988 = vrsqrt.f32 %v471_v30  ;;  %1728 = vmatpush3.bf16.xpose.msra.mxu1 %v1727_v28  ;;  %v582_v39 = vmul.f32 %v2111_v27, %v1979_v31  ;;  %v2120_v31 = vld [vmem:[%s2446_s29 + $0x370] sm:$0xff] }
 0x197   : > { %1990 = vrsqrt.f32 %v470_v29  ;;  %v353_v8 = vpop.xlane.xlu1 %352 }
 0x198   : > { %v1981_v9 = vpop.eup %1980  ;;  %v457_v42 = vmax.f32 %v353_v8, 1e-24  ;;  %v351_v43 = vpop.xlane.xlu0 %350  ;;  %v1697_v44 = vpack.c.bf16 %v583_v38, %v582_v39 }
 0x199   : > { %v1983_v60 = vpop.eup %1982  ;;  %v456_v47 = vmax.f32 %v351_v43, 1e-24  ;;  %v615_v45 = vmul.f32 %v2112_v34, %v1981_v9  ;;  %v2123_v34 = vld [vmem:[%s2446_s29 + $0x60] sm:$0xff] }
 0x19a   : > { %1992 = vrsqrt.f32 %v457_v42  ;;  %1698 = vmatprep.subr.bf16.mxu0 %v1697_v44  ;;  %v614_v20 = vmul.f32 %v2113_v50, %v1983_v60  ;;  %v2122_v60 = vld [vmem:[%s2446_s29 + $0x70] sm:$0xff] }
 0x19b   : > { %1994 = vrsqrt.f32 %v456_v47  ;;  %v417_v35 = vpop.xlane.xlu1 %416 }
 0x19c   : > { %v1985_v51 = vpop.eup %1984  ;;  %v489_v32 = vmax.f32 %v417_v35, 1e-24  ;;  %v415_v21 = vpop.xlane.xlu0 %414  ;;  %v1729_v33 = vpack.c.bf16 %v615_v45, %v614_v20 }
 0x19d   : > { %v1987_v62 = vpop.eup %1986  ;;  %v488_v63 = vmax.f32 %v415_v21, 1e-24  ;;  %v567_v0 = vmul.f32 %v2114_v3, %v1985_v51  ;;  %v2125_v3 = vld [vmem:[%s2446_s29 + $0x260] sm:$0xff] }
 0x19e   : > { %1996 = vrsqrt.f32 %v489_v32  ;;  %1730 = vmatprep.subr.bf16.mxu1 %v1729_v33  ;;  %v566_v2 = vmul.f32 %v2115_v4, %v1987_v62  ;;  %v2124_v62 = vld [vmem:[%s2446_s29 + $0x270] sm:$0xff] }
 0x19f   : > { %1998 = vrsqrt.f32 %v488_v63  ;;  %v321_v49 = vpop.xlane.xlu1 %320 }
 0x1a0   : > { %v1989_v54 = vpop.eup %1988  ;;  %v441_v13 = vmax.f32 %v321_v49, 1e-24  ;;  %v319_v7 = vpop.xlane.xlu0 %318  ;;  %v1699_v55 = vpack.c.bf16 %v567_v0, %v566_v2 }
 0x1a1   : > { %v1991_v1 = vpop.eup %1990  ;;  %v440_v24 = vmax.f32 %v319_v7, 1e-24  ;;  %v599_v11 = vmul.f32 %v2116_v37, %v1989_v54  ;;  %v2127_v37 = vld [vmem:[%s2446_s29 + $0x180] sm:$0xff] }
 0x1a2   : > { %2000 = vrsqrt.f32 %v441_v13  ;;  %1700 = vmatpush3.bf16.xpose.msra.mxu0 %v1699_v55  ;;  %v598_v25 = vmul.f32 %v2117_v5, %v1991_v1  ;;  %v2126_v1 = vld [vmem:[%s2446_s29 + $0x190] sm:$0xff] }
 0x1a3   : > { %2002 = vrsqrt.f32 %v440_v24  ;;  %v385_v58 = vpop.xlane.xlu1 %384 }
 0x1a4   : > { %v1993_v53 = vpop.eup %1992  ;;  %v473_v59 = vmax.f32 %v385_v58, 1e-24  ;;  %v383_v6 = vpop.xlane.xlu0 %382  ;;  %v1731_v14 = vpack.c.bf16 %v599_v11, %v598_v25 }
 0x1a5   : > { %v1995_v15 = vpop.eup %1994  ;;  %v472_v22 = vmax.f32 %v383_v6, 1e-24  ;;  %v585_v16 = vmul.f32 %v2118_v18, %v1993_v53  ;;  %v2129_v18 = vld [vmem:[%s2446_s29 + $0x380] sm:$0xff] }
 0x1a6   : > { %2004 = vrsqrt.f32 %v473_v59  ;;  %1732 = vmatpush3.bf16.xpose.msra.mxu1 %v1731_v14  ;;  %v584_v23 = vmul.f32 %v2119_v19, %v1995_v15  ;;  %v2128_v15 = vld [vmem:[%s2446_s29 + $0x390] sm:$0xff] }
 0x1a7   : > { %2006 = vrsqrt.f32 %v472_v22  ;;  %v357_v40 = vpop.xlane.xlu1 %356 }
 0x1a8   : > { %v1997_v17 = vpop.eup %1996  ;;  %v459_v41 = vmax.f32 %v357_v40, 1e-24  ;;  %v355_v56 = vpop.xlane.xlu0 %354  ;;  %v1701_v30 = vpack.c.bf16 %v585_v16, %v584_v23 }
 0x1a9   : > { %v1999_v57 = vpop.eup %1998  ;;  %v458_v28 = vmax.f32 %v355_v56, 1e-24  ;;  %v617_v29 = vmul.f32 %v2120_v31, %v1997_v17  ;;  %v2131_v31 = vld [vmem:[%s2446_s29 + $0x80] sm:$0xff] }
 0x1aa   : > { %2008 = vrsqrt.f32 %v459_v41  ;;  %1702 = vmatprep.subr.bf16.mxu0 %v1701_v30  ;;  %v616_v38 = vmul.f32 %v2121_v26, %v1999_v57  ;;  %v2130_v57 = vld [vmem:[%s2446_s29 + $0x90] sm:$0xff] }
 0x1ab   : > { %2010 = vrsqrt.f32 %v458_v28  ;;  %v421_v27 = vpop.xlane.xlu1 %420 }
 0x1ac   : > { %v2001_v39 = vpop.eup %2000  ;;  %v491_v8 = vmax.f32 %v421_v27, 1e-24  ;;  %v419_v9 = vpop.xlane.xlu0 %418  ;;  %v1733_v42 = vpack.c.bf16 %v617_v29, %v616_v38 }
 0x1ad   : > { %v2003_v43 = vpop.eup %2002  ;;  %v490_v44 = vmax.f32 %v419_v9, 1e-24  ;;  %v569_v47 = vmul.f32 %v2122_v60, %v2001_v39  ;;  %v2133_v60 = vld [vmem:[%s2446_s29 + $0x280] sm:$0xff] }
 0x1ae   : > { %2012 = vrsqrt.f32 %v491_v8  ;;  %1734 = vmatprep.subr.bf16.mxu1 %v1733_v42  ;;  %v568_v45 = vmul.f32 %v2123_v34, %v2003_v43  ;;  %v2132_v43 = vld [vmem:[%s2446_s29 + $0x290] sm:$0xff] }
 0x1af   : > { %2014 = vrsqrt.f32 %v490_v44  ;;  %v325_v50 = vpop.xlane.xlu1 %324 }
 0x1b0   : > { %v2005_v20 = vpop.eup %2004  ;;  %v443_v35 = vmax.f32 %v325_v50, 1e-24  ;;  %v323_v51 = vpop.xlane.xlu0 %322  ;;  %v1703_v32 = vpack.c.bf16 %v569_v47, %v568_v45 }
 0x1b1   : > { %v2007_v21 = vpop.eup %2006  ;;  %v442_v33 = vmax.f32 %v323_v51, 1e-24  ;;  %v601_v63 = vmul.f32 %v2124_v62, %v2005_v20  ;;  %v2135_v62 = vld [vmem:[%s2446_s29 + $0x1a0] sm:$0xff] }
 0x1b2   : > { %2016 = vrsqrt.f32 %v443_v35  ;;  %1704 = vmatpush3.bf16.xpose.msra.mxu0 %v1703_v32  ;;  %v600_v0 = vmul.f32 %v2125_v3, %v2007_v21  ;;  %v2134_v21 = vld [vmem:[%s2446_s29 + $0x1b0] sm:$0xff] }
 0x1b3   : > { %2018 = vrsqrt.f32 %v442_v33  ;;  %v389_v4 = vpop.xlane.xlu1 %388 }
 0x1b4   : > { %v2009_v2 = vpop.eup %2008  ;;  %v475_v49 = vmax.f32 %v389_v4, 1e-24  ;;  %v387_v54 = vpop.xlane.xlu0 %386  ;;  %v1735_v13 = vpack.c.bf16 %v601_v63, %v600_v0 }
 0x1b5   : > { %v2011_v7 = vpop.eup %2010  ;;  %v474_v55 = vmax.f32 %v387_v54, 1e-24  ;;  %v587_v24 = vmul.f32 %v2126_v1, %v2009_v2  ;;  %v2137_v1 = vld [vmem:[%s2446_s29 + $0x3a0] sm:$0xff] }
 0x1b6   : > { %2020 = vrsqrt.f32 %v475_v49  ;;  %1736 = vmatpush3.bf16.xpose.msra.mxu1 %v1735_v13  ;;  %v586_v11 = vmul.f32 %v2127_v37, %v2011_v7  ;;  %v2136_v7 = vld [vmem:[%s2446_s29 + $0x3b0] sm:$0xff] }
 0x1b7   : > { %2022 = vrsqrt.f32 %v474_v55  ;;  %v361_v5 = vpop.xlane.xlu1 %360 }
 0x1b8   : > { %v2013_v25 = vpop.eup %2012  ;;  %v461_v58 = vmax.f32 %v361_v5, 1e-24  ;;  %v359_v53 = vpop.xlane.xlu0 %358  ;;  %v1705_v59 = vpack.c.bf16 %v587_v24, %v586_v11 }
 0x1b9   : > { %v2015_v6 = vpop.eup %2014  ;;  %v460_v14 = vmax.f32 %v359_v53, 1e-24  ;;  %v619_v22 = vmul.f32 %v2128_v15, %v2013_v25  ;;  %v2139_v15 = vld [vmem:[%s2446_s29 + $0xa0] sm:$0xff] }
 0x1ba   : > { %2024 = vrsqrt.f32 %v461_v58  ;;  %1706 = vmatprep.subr.bf16.mxu0 %v1705_v59  ;;  %v618_v16 = vmul.f32 %v2129_v18, %v2015_v6  ;;  %v2138_v6 = vld [vmem:[%s2446_s29 + $0xb0] sm:$0xff] }
 0x1bb   : > { %2026 = vrsqrt.f32 %v460_v14  ;;  %v425_v19 = vpop.xlane.xlu1 %424 }
 0x1bc   : > { %v2017_v23 = vpop.eup %2016  ;;  %v493_v40 = vmax.f32 %v425_v19, 1e-24  ;;  %v423_v17 = vpop.xlane.xlu0 %422  ;;  %v1737_v41 = vpack.c.bf16 %v619_v22, %v618_v16 }
 0x1bd   : > { %v2019_v56 = vpop.eup %2018  ;;  %v492_v30 = vmax.f32 %v423_v17, 1e-24  ;;  %v571_v28 = vmul.f32 %v2130_v57, %v2017_v23  ;;  %v2141_v57 = vld [vmem:[%s2446_s29 + $0x2a0] sm:$0xff] }
 0x1be   : > { %2028 = vrsqrt.f32 %v493_v40  ;;  %1738 = vmatprep.subr.bf16.mxu1 %v1737_v41  ;;  %v570_v29 = vmul.f32 %v2131_v31, %v2019_v56  ;;  %v2140_v56 = vld [vmem:[%s2446_s29 + $0x2b0] sm:$0xff] }
 0x1bf   : > { %2030 = vrsqrt.f32 %v492_v30  ;;  %v329_v26 = vpop.xlane.xlu1 %328 }
 0x1c0   : > { %v2021_v38 = vpop.eup %2020  ;;  %v445_v27 = vmax.f32 %v329_v26, 1e-24  ;;  %v327_v39 = vpop.xlane.xlu0 %326  ;;  %v1707_v8 = vpack.c.bf16 %v571_v28, %v570_v29 }
 0x1c1   : > { %v2023_v9 = vpop.eup %2022  ;;  %v444_v42 = vmax.f32 %v327_v39, 1e-24  ;;  %v603_v44 = vmul.f32 %v2132_v43, %v2021_v38  ;;  %v2143_v43 = vld [vmem:[%s2446_s29 + $0x1c0] sm:$0xff] }
 0x1c2   : > { %2032 = vrsqrt.f32 %v445_v27  ;;  %1708 = vmatpush3.bf16.xpose.msra.mxu0 %v1707_v8  ;;  %v602_v47 = vmul.f32 %v2133_v60, %v2023_v9  ;;  %v2142_v9 = vld [vmem:[%s2446_s29 + $0x1d0] sm:$0xff] }
 0x1c3   : > { %2034 = vrsqrt.f32 %v444_v42  ;;  %v393_v34 = vpop.xlane.xlu1 %392 }
 0x1c4   : > { %v2025_v45 = vpop.eup %2024  ;;  %v477_v50 = vmax.f32 %v393_v34, 1e-24  ;;  %v391_v20 = vpop.xlane.xlu0 %390  ;;  %v1739_v35 = vpack.c.bf16 %v603_v44, %v602_v47 }
 0x1c5   : > { %v2027_v51 = vpop.eup %2026  ;;  %v476_v32 = vmax.f32 %v391_v20, 1e-24  ;;  %v589_v33 = vmul.f32 %v2134_v21, %v2025_v45  ;;  %v2145_v21 = vld [vmem:[%s2446_s29 + $0x3c0] sm:$0xff] }
 0x1c6   : > { %2036 = vrsqrt.f32 %v477_v50  ;;  %1740 = vmatpush3.bf16.xpose.msra.mxu1 %v1739_v35  ;;  %v588_v63 = vmul.f32 %v2135_v62, %v2027_v51  ;;  %v2144_v51 = vld [vmem:[%s2446_s29 + $0x3d0] sm:$0xff] }
 0x1c7   : > { %2038 = vrsqrt.f32 %v476_v32  ;;  %v365_v3 = vpop.xlane.xlu1 %364 }
 0x1c8   : > { %v2029_v0 = vpop.eup %2028  ;;  %v463_v4 = vmax.f32 %v365_v3, 1e-24  ;;  %v363_v2 = vpop.xlane.xlu0 %362  ;;  %v1709_v49 = vpack.c.bf16 %v589_v33, %v588_v63 }
 0x1c9   : > { %v2031_v54 = vpop.eup %2030  ;;  %v462_v13 = vmax.f32 %v363_v2, 1e-24  ;;  %v621_v55 = vmul.f32 %v2136_v7, %v2029_v0  ;;  %v2147_v7 = vld [vmem:[%s2446_s29 + $0xc0] sm:$0xff] }
 0x1ca   : > { %2040 = vrsqrt.f32 %v463_v4  ;;  %1710 = vmatprep.subr.bf16.mxu0 %v1709_v49  ;;  %v620_v24 = vmul.f32 %v2137_v1, %v2031_v54  ;;  %v2146_v54 = vld [vmem:[%s2446_s29 + $0xd0] sm:$0xff] }
 0x1cb   : > { %2042 = vrsqrt.f32 %v462_v13  ;;  %v429_v37 = vpop.xlane.xlu1 %428 }
 0x1cc   : > { %v2033_v11 = vpop.eup %2032  ;;  %v495_v5 = vmax.f32 %v429_v37, 1e-24  ;;  %v427_v25 = vpop.xlane.xlu0 %426  ;;  %v1741_v58 = vpack.c.bf16 %v621_v55, %v620_v24 }
 0x1cd   : > { %v2035_v53 = vpop.eup %2034  ;;  %v494_v59 = vmax.f32 %v427_v25, 1e-24  ;;  %v573_v14 = vmul.f32 %v2138_v6, %v2033_v11  ;;  %v2149_v6 = vld [vmem:[%s2446_s29 + $0x2c0] sm:$0xff] }
 0x1ce   : > { %2044 = vrsqrt.f32 %v495_v5  ;;  %1742 = vmatprep.subr.bf16.mxu1 %v1741_v58  ;;  %v572_v22 = vmul.f32 %v2139_v15, %v2035_v53  ;;  %v2148_v53 = vld [vmem:[%s2446_s29 + $0x2d0] sm:$0xff] }
 0x1cf   : > { %2046 = vrsqrt.f32 %v494_v59  ;;  %v333_v18 = vpop.xlane.xlu1 %332 }
 0x1d0   : > { %v2037_v16 = vpop.eup %2036  ;;  %v447_v19 = vmax.f32 %v333_v18, 1e-24  ;;  %v331_v23 = vpop.xlane.xlu0 %330  ;;  %v1711_v40 = vpack.c.bf16 %v573_v14, %v572_v22 }
 0x1d1   : > { %v2039_v17 = vpop.eup %2038  ;;  %v446_v41 = vmax.f32 %v331_v23, 1e-24  ;;  %v605_v30 = vmul.f32 %v2140_v56, %v2037_v16  ;;  %v2151_v56 = vld [vmem:[%s2446_s29 + $0x1e0] sm:$0xff] }
 0x1d2   : > { %2048 = vrsqrt.f32 %v447_v19  ;;  %1712 = vmatpush3.bf16.xpose.msra.mxu0 %v1711_v40  ;;  %v604_v28 = vmul.f32 %v2141_v57, %v2039_v17  ;;  %v2150_v17 = vld [vmem:[%s2446_s29 + $0x1f0] sm:$0xff] }
 0x1d3   : > { %2050 = vrsqrt.f32 %v446_v41  ;;  %v397_v31 = vpop.xlane.xlu1 %396 }
 0x1d4   : > { %v2041_v29 = vpop.eup %2040  ;;  %v479_v26 = vmax.f32 %v397_v31, 1e-24  ;;  %v395_v38 = vpop.xlane.xlu0 %394  ;;  %v1743_v27 = vpack.c.bf16 %v605_v30, %v604_v28 }
 0x1d5   : > { %v2043_v39 = vpop.eup %2042  ;;  %v478_v8 = vmax.f32 %v395_v38, 1e-24  ;;  %v591_v42 = vmul.f32 %v2142_v9, %v2041_v29 }
 0x1d6   : > { %2052 = vrsqrt.f32 %v479_v26  ;;  %1744 = vmatpush3.bf16.xpose.msra.mxu1 %v1743_v27  ;;  %v590_v44 = vmul.f32 %v2143_v43, %v2043_v39 }
 0x1d7   : > { %2054 = vrsqrt.f32 %v478_v8  ;;  %v369_v60 = vpop.xlane.xlu1 %368 }
 0x1d8   : > { %v2045_v47 = vpop.eup %2044  ;;  %v465_v34 = vmax.f32 %v369_v60, 1e-24  ;;  %v367_v45 = vpop.xlane.xlu0 %366  ;;  %v1713_v50 = vpack.c.bf16 %v591_v42, %v590_v44 }
 0x1d9   : > { %v2047_v20 = vpop.eup %2046  ;;  %v464_v35 = vmax.f32 %v367_v45, 1e-24  ;;  %v623_v32 = vmul.f32 %v2144_v51, %v2045_v47 }
 0x1da   : > { %2056 = vrsqrt.f32 %v465_v34  ;;  %1714 = vmatprep.subr.bf16.mxu0 %v1713_v50  ;;  %v622_v33 = vmul.f32 %v2145_v21, %v2047_v20 }
 0x1db   : > { %2058 = vrsqrt.f32 %v464_v35  ;;  %v433_v62 = vpop.xlane.xlu1 %432 }
 0x1dc   : > { %v2049_v63 = vpop.eup %2048  ;;  %v497_v3 = vmax.f32 %v433_v62, 1e-24  ;;  %v431_v0 = vpop.xlane.xlu0 %430  ;;  %v1745_v4 = vpack.c.bf16 %v623_v32, %v622_v33 }
 0x1dd   : > { %v2051_v2 = vpop.eup %2050  ;;  %v496_v49 = vmax.f32 %v431_v0, 1e-24  ;;  %v575_v13 = vmul.f32 %v2146_v54, %v2049_v63 }
 0x1de   : > { %2060 = vrsqrt.f32 %v497_v3  ;;  %1746 = vmatprep.subr.bf16.mxu1 %v1745_v4  ;;  %v574_v55 = vmul.f32 %v2147_v7, %v2051_v2 }
 0x1df   : > { %2062 = vrsqrt.f32 %v496_v49  ;;  %v337_v1 = vpop.xlane.xlu1 %336 }
 0x1e0   : > { %v2053_v24 = vpop.eup %2052  ;;  %v449_v37 = vmax.f32 %v337_v1, 1e-24  ;;  %v335_v11 = vpop.xlane.xlu0 %334  ;;  %v1715_v5 = vpack.c.bf16 %v575_v13, %v574_v55 }
 0x1e1   : > { %v2055_v25 = vpop.eup %2054  ;;  %v448_v58 = vmax.f32 %v335_v11, 1e-24  ;;  %v607_v59 = vmul.f32 %v2148_v53, %v2053_v24 }
 0x1e2   : > { %2064 = vrsqrt.f32 %v449_v37  ;;  %1716 = vmatpush3.bf16.xpose.msra.mxu0 %v1715_v5  ;;  %v606_v14 = vmul.f32 %v2149_v6, %v2055_v25 }
 0x1e3   : > { %2066 = vrsqrt.f32 %v448_v58  ;;  %v401_v15 = vpop.xlane.xlu1 %400 }
 0x1e4   : > { %v2057_v22 = vpop.eup %2056  ;;  %v481_v18 = vmax.f32 %v401_v15, 1e-24  ;;  %v399_v16 = vpop.xlane.xlu0 %398  ;;  %v1747_v19 = vpack.c.bf16 %v607_v59, %v606_v14 }
 0x1e5   : > { %v2059_v23 = vpop.eup %2058  ;;  %v480_v40 = vmax.f32 %v399_v16, 1e-24  ;;  %v593_v41 = vmul.f32 %v2150_v17, %v2057_v22 }
 0x1e6   : > { %2068 = vrsqrt.f32 %v481_v18  ;;  %1748 = vmatpush3.bf16.xpose.msra.mxu1 %v1747_v19  ;;  %v592_v30 = vmul.f32 %v2151_v56, %v2059_v23 }
 0x1e7   : > { %2070 = vrsqrt.f32 %v480_v40 }
 0x1e8   : > { %v2061_v57 = vpop.eup %2060  ;;  %v1717_v28 = vpack.c.bf16 %v593_v41, %v592_v30 }
 0x1e9   : > { %v2063_v31 = vpop.eup %2062  ;;  %v625_v29 = vmul.f32 %v2061_v57, %v2789_v46 }
 0x1ea   : > { %1718 = vmatprep.subr.bf16.mxu0 %v1717_v28  ;;  %v624_v26 = vmul.f32 %v2063_v31, %v2792_v61 }
 0x1ec   : > { %v2065_v38 = vpop.eup %2064  ;;  %v1749_v27 = vpack.c.bf16 %v625_v29, %v624_v26 }
 0x1ed   : > { %v2067_v39 = vpop.eup %2066  ;;  %v577_v8 = vmul.f32 %v2065_v38, %v2801_v12 }
 0x1ee   : > { %1750 = vmatprep.subr.bf16.mxu1 %v1749_v27  ;;  %v576_v9 = vmul.f32 %v2067_v39, %v2804_v48 }
 0x1f0   : > { %v2069_v42 = vpop.eup %2068  ;;  %v1719_v43 = vpack.c.bf16 %v577_v8, %v576_v9 }
 0x1f1   : > { %v2071_v44 = vpop.eup %2070  ;;  %v609_v60 = vmul.f32 %v2069_v42, %v2813_v10 }
 0x1f2   : > { %1720 = vmatpush3.bf16.xpose.msra.mxu0 %v1719_v43  ;;  %v608_v46 = vmul.f32 %v2071_v44, %v2816_v52 }
 0x1f4   : > { %v1751_v47 = vpack.c.bf16 %v609_v60, %v608_v46 }
 0x1f6   : > { %1752 = vmatpush3.bf16.xpose.msra.mxu1 %v1751_v47 }
 0x1f9   : > { %1590 = vmatmul.mubr.f32.vlgmr.msra.gmra.mrb[0].mxu0 %v2842_v36 }
 0x1fd   : > { %1624 = vmatmul.mubr.f32.vlgmr.msra.gmra.mrb[0].mxu1 %v2842_v36 }
 0x2cc   : > { %v1284_v61 = vpop.f32.mrb[0].mxu0 }
 0x2cd   : > { %v1360_v12 = vmul.f32 0.5, %v1284_v61  ;;  %v1286_v34 = vpop.f32.mrb[1].mxu0 }
 0x2ce   : > { %v1361_v48 = vmul.f32 0.5, %v1286_v34 }
 0x2cf   : > { %v1364_v45 = vsub.f32 1.0, %v1360_v12 }
 0x2d0   : > { %v1365_v50 = vsub.f32 1.0, %v1361_v48  ;;  %v1355_v20 = vpop.f32.mrb[0].mxu1 }
 0x2d1   : > { %1368 = vst [vmem:[%s175_s23] sm:$0xff] %v1364_v45  ;;  %v1362_v10 = vmul.f32 0.5, %v1355_v20  ;;  %v1357_v52 = vpop.f32.mrb[1].mxu1 }
 0x2d2   : > { %1369 = vst [vmem:[%s175_s23 + $0x8] sm:$0xff] %v1365_v50  ;;  %v1363_v35 = vmul.f32 0.5, %v1357_v52 }
 0x2d3   : > { %v1366_v51 = vsub.f32 1.0, %v1362_v10 }
 0x2d4   : > { %v1367_v36 = vsub.f32 1.0, %v1363_v35 }
 0x2d5   : > { %1370 = vst [vmem:[%s175_s23 + $0x10] sm:$0xff] %v1366_v51 }
 0x2d6   : > { %1371 = vst [vmem:[%s175_s23 + $0x18] sm:$0xff] %v1367_v36 }
 0x2d7   : > { %2223 = shalt.err (!%p2220_p13)
}
 0x2d8   : > { %s2224_s17 = scalar_lea.hbm %s2917_s7, 512  ;;  %s2228_s3 = scalar_lea.hbm %s2963_s2, 1024 }
 0x2d9   : > { %p2225_p7 = scmp.ne.s32.totalorder %s2917_s7, %s2224_s17  ;;  %p2229_p1 = scmp.lt.u32.totalorder %s2917_s7, %s2963_s2 }
 0x2da   : > { %p2230_p8 = scmp.lt.u32.totalorder %s2228_s3, %s2224_s17  ;;  %p2232_p9 = scmp.lt.u32.totalorder %s2224_s17, %s2917_s7 }
 0x2db   : > { %p2226_p3 = pnand %p2225_p7, %p2982_p10 }
 0x2dc   : > { %p2231_p11 = por %p2230_p8, %p2229_p1 }
 0x2dd   : > { %p2227_p12 = pneg %p2226_p3 }
 0x2de   : > { %p2233_p2 = por %p2232_p9, %p2231_p11 }
 0x2e0   : > { %p2234_p4 = pnand %p2233_p2, %p2227_p12 }
 0x2e2   : > { %2237 = shalt.err (!%p2234_p4)
}
 0x2e3   : > { %1763 = dma.vmem_to_hbm [thread:$0]  (%p2982_p10), %s2919_s30, 512, %s2917_s7, %s1373_s8  }
 0x2e4 PF: > { %s1399_s25 = sand.u32 1, %s2268_s9   ;;  %p2983_p5 = scmp.ne.s32.totalorder %s2972_s22, 0 }
 0x2e5   : > { %p2984_p0 = scmp.ge.s32.totalorder %s2280_s12, 2  ;;  %s1400_s29 = scalar_lea.sflag [#allocation4], %s1399_s25 }
 0x2e7   : > { %p1774_p6 = pnand %p2984_p0, %p2983_p5 }
 0x2e9   : > { %2263 = dma.done.wait (!%p1774_p6), %s1400_s29, 512  }
 0x2ea   : > { %2265 = vsyncadd (!%p1774_p6), %s1400_s29, 4294966784  ;;  %p16_p13 = scmp.ge.s32.totalorder %s2327_s15, 4   ;;  %s2985_s9 = smov %s2272_s10 }
 0x2eb   : > { %s2986_s10 = smov %s2276_s11  ;;  %s2987_s11 = smov %s2339_s18 }
 0x2ec   : > { %s2988_s12 = smov %s2327_s15  ;;  %18 = sbr.rel (!%p16_p13) target bundleno = 6 (0x6), region = 78 }
 0x2f3   :  { %1405 = vsyncpa [#allocation3], 1 }
 0x2f4   :  { %1407 = vsyncpa [#allocation3 + $0x1], 1 }
 0x2f5   :  { %1408 = vsyncpa [#allocation6], 1 }
 0x2f6   :  { %1410 = vsyncpa [#allocation6 + $0x1], 1 }
 0x2f7   :  { %1411 = vsyncpa [#allocation4], 1 }
 0x2f8   :  { %1413 = vsyncpa [#allocation4 + $0x1], 1 }

</bundles_post_ra>
